<compile_context>
chip_gen: v7x
topology: tpu7x:2x2x1
jax: 0.10.0
libtpu: 0.0.40
codegen_flags: <defaults>
</compile_context>

<pallas_src>
import math

import jax
import jax.numpy as jnp
from jax import lax
from jax.experimental import pallas as pl
from jax.experimental.pallas import tpu as pltpu

# ----------------------------------------------------------------------------
# Config (mirrors the fields used by the PyTorch module)
# ----------------------------------------------------------------------------
CONFIG = dict(
    hidden_size=32,
    num_categories=10,
    sku_hash_size=100,
    url_hash_size=50,
    item_embedding_dim=16,
    url_embedding_dim=16,
    dropout=0.1,            # eval mode -> dropout is identity
)

# Row indices inside the packed (24, 128) f32 vector slab ----------------------
R_ITLN_G, R_ITLN_B, R_URLN_G, R_URLN_B = 0, 1, 2, 3           # item/url input LN
R_PROJ_B = 4                                                   # [nm_b | it_b | ur_b] (96)
R_NM_G, R_NM_B = 5, 6                                          # name_mlp LN (32)
R_ITP_G, R_ITP_B = 7, 8                                        # item_projection LN (32)
R_URP_G, R_URP_B = 9, 10                                       # url_projection  LN (32)
R_IMP_B1, R_IMP_G, R_IMP_BETA, R_IMP_W2, R_IMP_B2 = 11, 12, 13, 14, 15   # importance net
R_FUS_B1, R_FUS1_G, R_FUS1_B = 16, 17, 18                      # fusion layer 1 (64)
R_FUS_B2, R_FUS2_G, R_FUS2_B = 19, 20, 21                      # fusion layer 2 (32)
N_VEC_ROWS = 24                                                # padded to multiple of 8


def _ln(x, g, b, eps=1e-5):
    """LayerNorm over last dim (PyTorch semantics: biased variance, eps=1e-5)."""
    mu = jnp.mean(x, axis=-1, keepdims=True)
    var = jnp.mean((x - mu) ** 2, axis=-1, keepdims=True)
    return (x - mu) * lax.rsqrt(var + eps) * g + b


# ----------------------------------------------------------------------------
# Pallas kernel: processes a tile of TM tokens end-to-end.
# ----------------------------------------------------------------------------
def encoder_kernel(feats5_ref, it_ref, ur_ref,
                   emb_g_ref, emb_b_ref, vec_ref,
                   projW_ref, impW_ref, mask_ref, fusW1_ref, fusW2_ref,
                   out_ref):
    f32 = jnp.float32
    bf16 = jnp.bfloat16
    TM, H = out_ref.shape
    Di = it_ref.shape[-1]
    Du = ur_ref.shape[-1]

    vec = vec_ref[...]                         # (24, 128) f32

    def vrow(r, w):
        return vec[r:r + 1, :w]                # (1, w) static slice

    # --- five H-dim embedding features: one batched LayerNorm ((5,TM,H)) -----
    x5 = _ln(feats5_ref[...], emb_g_ref[...], emb_b_ref[...])   # (5, TM, H)
    ev, cat, pr, nm0, qr = x5[0], x5[1], x5[2], x5[3], x5[4]     # each (TM, H)

    # --- item / url input LayerNorms (over Di / Du) ---------------------------
    it_in = _ln(it_ref[...], vrow(R_ITLN_G, Di), vrow(R_ITLN_B, Di))
    ur_in = _ln(ur_ref[...], vrow(R_URLN_G, Du), vrow(R_URLN_B, Du))

    # --- fused projections: one block-diagonal (64, 96) matmul in bf16 -------
    #   [nm0 | it_in | ur_in] (TM,64) @ blockdiag(nm_W, it_W, ur_W) -> (TM,96)
    pin = jnp.concatenate([nm0, it_in, ur_in], axis=-1).astype(bf16)
    pout = jnp.dot(pin, projW_ref[...], preferred_element_type=f32)
    pout = pout + vrow(R_PROJ_B, 3 * H)
    nm_lin = pout[:, 0:H]
    it_lin = pout[:, H:2 * H]
    ur_lin = pout[:, 2 * H:3 * H]
    nm = _ln(jnp.maximum(nm_lin, 0.0), vrow(R_NM_G, H), vrow(R_NM_B, H))     # ReLU -> LN
    itf = jnp.maximum(_ln(it_lin, vrow(R_ITP_G, H), vrow(R_ITP_B, H)), 0.0)  # LN -> ReLU
    urf = jnp.maximum(_ln(ur_lin, vrow(R_URP_G, H), vrow(R_URP_B, H)), 0.0)  # LN -> ReLU

    # feature order matches the PyTorch module
    feats = [ev, cat, pr, nm, qr, itf, urf]

    # --- per-feature L2 normalize (F.normalize, eps=1e-12) --------------------
    nrms, dens = [], []
    for f in feats:
        ss = jnp.maximum(jnp.sum(f * f, axis=-1, keepdims=True), 1e-24)
        inv = lax.rsqrt(ss)                    # 1 / max(||f||, 1e-12)  (EUP)
        nrms.append(f * inv)
        dens.append(ss * inv)                  # = max(||f||, 1e-12)
    nrm_cat = jnp.concatenate(nrms, axis=-1)   # (TM, 7H) = (TM, 224)
    den_cat = jnp.concatenate(dens, axis=-1)   # (TM, 7)

    # --- importance net: lane-concat block-diagonal matmul (TM,224)@(224,448) -
    h = jnp.dot(nrm_cat.astype(bf16), impW_ref[...], preferred_element_type=f32)
    b1 = vrow(R_IMP_B1, 64)
    g64 = vrow(R_IMP_G, 64)
    beta64 = vrow(R_IMP_BETA, 64)
    w2row = vrow(R_IMP_W2, 64)
    b2 = vec[R_IMP_B2:R_IMP_B2 + 1, 0:1]

    score_cols = []
    for i in range(7):
        hi = h[:, 64 * i:64 * (i + 1)] + b1                    # (TM, 64)
        hi = jnp.maximum(_ln(hi, g64, beta64), 0.0)
        score_cols.append(jnp.sum(hi * w2row, axis=-1, keepdims=True))
    scores = jnp.concatenate(score_cols, axis=-1) + b2          # (TM, 7) lane-dense
    scores = 0.5 * (jnp.tanh(0.5 * scores) + 1.0)               # sigmoid via tanh (EUP)

    # --- 7-way softmax on the lane-dense (TM, 7) scores ------------------------
    m = jnp.max(scores, axis=-1, keepdims=True)
    e = jnp.exp(scores - m)
    w = e / jnp.sum(e, axis=-1, keepdims=True)                  # exact divide (cheap)

    # --- weighted features: broadcast (norm * weight) onto 32-lane segments ----
    #   feat_i * w_i == nrm_i * (||feat_i|| * w_i); one 0/1-mask matmul broadcast
    sw = (den_cat * w).astype(bf16)                             # (TM, 7)
    scale = jnp.dot(sw, mask_ref[...], preferred_element_type=f32)   # (TM, 224)
    wf = (nrm_cat * scale).astype(bf16)                         # (TM, 7H)

    # --- fusion MLP: Linear(7H,2H) -> LN -> ReLU -> Linear(2H,H) -> LN -> tanh -
    h1 = jnp.dot(wf, fusW1_ref[...], preferred_element_type=f32) + vrow(R_FUS_B1, 2 * H)
    h1 = jnp.maximum(_ln(h1, vrow(R_FUS1_G, 2 * H), vrow(R_FUS1_B, 2 * H)), 0.0)
    h2 = jnp.dot(h1.astype(bf16), fusW2_ref[...], preferred_element_type=f32)
    h2 = h2 + vrow(R_FUS_B2, H)
    fused = jnp.tanh(_ln(h2, vrow(R_FUS2_G, H), vrow(R_FUS2_B, H)))
    fused = jnp.where(jnp.isnan(fused), 0.0, fused)
    out_ref[...] = jnp.clip(fused, -5.0, 5.0)


# ----------------------------------------------------------------------------
# Parameter packing (few slabs, weights pre-cast to bf16)
# ----------------------------------------------------------------------------
def _round_up(x, m):
    return ((x + m - 1) // m) * m


def _pad_row(v):
    v = jnp.ravel(v).astype(jnp.float32)
    return jnp.pad(v, (0, 128 - v.shape[0]))


def _pack_params(p, H, Di, Du):
    f32, bf16 = jnp.float32, jnp.bfloat16

    # LN params of the five H-dim embedding features, stacked for a batched LN.
    emb_g = jnp.stack([p["ev_g"], p["cat_g"], p["pr_g"], p["nm_g"], p["qr_g"]], axis=0)  # (5,1,H)
    emb_b = jnp.stack([p["ev_b"], p["cat_b"], p["pr_b"], p["nm_b"], p["qr_b"]], axis=0)

    rows = [
        p["it_ln_g"], p["it_ln_b"], p["ur_ln_g"], p["ur_ln_b"],
        jnp.concatenate([p["nm_mlp_b"], p["it_b"], p["ur_b"]], axis=-1),       # (1,96)
        p["nm_mlp_g"], p["nm_mlp_beta"],
        p["it_proj_g"], p["it_proj_b"],
        p["ur_proj_g"], p["ur_proj_b"],
        p["imp_b1"], p["imp_ln_g"], p["imp_ln_b"],
        p["imp_W2"].reshape(1, -1), p["imp_b2"],
        p["fus_b1"], p["fus_ln1_g"], p["fus_ln1_b"],
        p["fus_b2"], p["fus_ln2_g"], p["fus_ln2_b"],
    ]
    rows = [_pad_row(r) for r in rows]
    while len(rows) < N_VEC_ROWS:
        rows.append(jnp.zeros((128,), f32))
    vec128 = jnp.stack(rows, axis=0)                                           # (24,128)

    # block-diagonal fused projection weight (64, 96), bf16
    projW = jnp.zeros((H + Di + Du, 3 * H), f32)
    projW = projW.at[0:H, 0:H].set(p["nm_mlp_W"])
    projW = projW.at[H:H + Di, H:2 * H].set(p["it_W"])
    projW = projW.at[H + Di:H + Di + Du, 2 * H:3 * H].set(p["ur_W"])
    projW = projW.astype(bf16)

    # block-diagonal importance weight (7H, 7*64), bf16
    impW = jnp.kron(jnp.eye(7, dtype=f32), p["imp_W1"]).astype(bf16)           # (224, 448)

    # 0/1 mask broadcasting a per-feature scalar onto its 32-lane segment
    maskM = jnp.kron(jnp.eye(7, dtype=f32), jnp.ones((1, H), f32)).astype(bf16)  # (7, 224)

    fusW1 = p["fus_W1"].astype(bf16)                                           # (7H, 2H)
    fusW2 = p["fus_W2"].astype(bf16)                                           # (2H, H)

    return [emb_g, emb_b, vec128, projW, impW, maskM, fusW1, fusW2]


# ----------------------------------------------------------------------------
# JAX wrapper (glue: clamps, hashing, gathers, EmbeddingBag pooling, padding)
# ----------------------------------------------------------------------------
def enhanced_feature_encoder(params, event_types, categories, prices, names,
                             queries, timestamps, item_ids, urls,
                             config=CONFIG, max_block_tokens=512):
    B, S, _ = names.shape
    H = config["hidden_size"]
    Di = config["item_embedding_dim"]
    Du = config["url_embedding_dim"]
    N = B * S

    # --- input sanitization (matches the PyTorch forward) ---------------------
    event_types = jnp.clip(event_types, 0, 4)
    categories = jnp.clip(categories, 0, config["num_categories"])
    prices = jnp.clip(prices, 0, 100)
    names = jnp.where(jnp.isnan(names), 0.0, names)
    queries = jnp.where(jnp.isnan(queries), 0.0, queries)
    timestamps = jnp.where(jnp.isnan(timestamps), 0.0, timestamps)   # unused downstream
    item_ids = jnp.clip(item_ids, 0, config["sku_hash_size"] - 1)
    urls = jnp.where(urls < 0, jnp.zeros_like(urls), urls)
    hashed_urls = urls % config["url_hash_size"]

    # --- embedding gathers (glue; LayerNorms run inside the kernel) -----------
    ev_raw = params["event_table"][event_types].reshape(N, H)
    cat_raw = params["cat_table"][categories].reshape(N, H)
    pr_raw = params["price_table"][prices].reshape(N, H)
    it_raw = params["item_table"][item_ids].reshape(N, Di).astype(jnp.float32)
    ur_raw = params["url_table"][hashed_urls].reshape(N, Du).astype(jnp.float32)

    def bag_mean(table, ids_f):
        # EmbeddingBag(mode='mean', padding_idx=0): padding entries excluded.
        ids = jnp.clip(ids_f.astype(jnp.int32), 0, table.shape[0] - 1).reshape(-1, 16)
        rows = table[ids]                                    # (N, 16, H)
        mask = (ids != 0).astype(jnp.float32)[..., None]
        ssum = jnp.sum(rows * mask, axis=1)
        cnt = jnp.sum(mask, axis=1)
        return jnp.where(cnt > 0, ssum / jnp.maximum(cnt, 1.0), 0.0)

    nm_bag = bag_mean(params["name_table"], names)            # (N, H)
    qr_bag = bag_mean(params["query_table"], queries)         # (N, H)

    # five H-dim features as one (5, N, H) slab (clean (TM,H) per-feature views)
    feats5 = jnp.stack([ev_raw, cat_raw, pr_raw, nm_bag, qr_bag], axis=0)
    feats5 = feats5.astype(jnp.float32)

    # --- tiling: big token tiles, EVEN grid-step count for v7x's 2 TCs --------
    TM = min(max_block_tokens, max(8, _round_up(-(-N // 2), 8)))
    steps = -(-N // TM)
    if steps > 1 and steps % 2 == 1:
        steps += 1
    N_pad = steps * TM
    if N_pad != N:
        pad = N_pad - N
        feats5 = jnp.pad(feats5, ((0, 0), (0, pad), (0, 0)))
        it_raw = jnp.pad(it_raw, ((0, pad), (0, 0)))
        ur_raw = jnp.pad(ur_raw, ((0, pad), (0, 0)))
    grid = (steps,)

    param_vals = _pack_params(params, H, Di, Du)

    def _const(ndim):
        return lambda i: (0,) * ndim

    in_specs = [
        pl.BlockSpec((5, TM, H), lambda i: (0, i, 0)),
        pl.BlockSpec((TM, Di), lambda i: (i, 0)),
        pl.BlockSpec((TM, Du), lambda i: (i, 0)),
    ] + [pl.BlockSpec(v.shape, _const(v.ndim)) for v in param_vals]
    out_spec = pl.BlockSpec((TM, H), lambda i: (i, 0))

    # rough cost hint so XLA schedules the surrounding gather glue sensibly
    mm_flops = 2 * ((H + Di + Du) * 3 * H + 7 * H * 7 * 64 + 7 * 7 * H
                    + 7 * H * 2 * H + 2 * H * H)
    in_bytes = sum(int(v.size) * v.dtype.itemsize for v in [feats5, it_raw, ur_raw] + param_vals)
    cost = pl.CostEstimate(
        flops=int(N_pad) * (mm_flops + 64 * H),
        transcendentals=int(N_pad) * 96,
        bytes_accessed=int(in_bytes + N_pad * H * 4),
    )

    out = pl.pallas_call(
        encoder_kernel,
        out_shape=jax.ShapeDtypeStruct((N_pad, H), jnp.float32),
        grid_spec=pltpu.PrefetchScalarGridSpec(
            num_scalar_prefetch=0,
            grid=grid,
            in_specs=in_specs,
            out_specs=out_spec,
        ),
        compiler_params=pltpu.CompilerParams(
            dimension_semantics=("parallel",)),
        cost_estimate=cost,
    )(feats5, it_raw, ur_raw, *param_vals)

    return out[:N].reshape(B, S, H)


# ----------------------------------------------------------------------------
# Deterministic parameter initialization (shapes match the PyTorch __init__)
# ----------------------------------------------------------------------------
def init_params(key, config=CONFIG):
    H = config["hidden_size"]
    Di = config["item_embedding_dim"]
    Du = config["url_embedding_dim"]

    keys = iter(jax.random.split(key, 64))

    def emb(rows, dim, std=0.01):
        return jax.random.normal(next(keys), (rows, dim), jnp.float32) * std

    def xavier(fan_in, fan_out):
        limit = math.sqrt(6.0 / (fan_in + fan_out))
        # stored as (in, out), i.e. already transposed for x @ W
        return jax.random.uniform(next(keys), (fan_in, fan_out), jnp.float32,
                                  -limit, limit)

    def ln(dim):
        return jnp.ones((1, dim), jnp.float32), jnp.zeros((1, dim), jnp.float32)

    p = {}
    # embedding tables
    p["event_table"] = emb(5, H)
    p["cat_table"] = emb(config["num_categories"] + 1, H)
    p["price_table"] = emb(101, H)
    p["item_table"] = emb(config["sku_hash_size"], Di)
    p["url_table"] = emb(config["url_hash_size"], Du)
    # EmbeddingBag tables (default N(0,1) init, padding row 0 zeroed)
    name_t = jax.random.normal(next(keys), (256, H), jnp.float32)
    p["name_table"] = name_t.at[0].set(0.0)
    query_t = jax.random.normal(next(keys), (256, H), jnp.float32)
    p["query_table"] = query_t.at[0].set(0.0)

    # LayerNorms
    p["ev_g"], p["ev_b"] = ln(H)
    p["cat_g"], p["cat_b"] = ln(H)
    p["pr_g"], p["pr_b"] = ln(H)
    p["nm_g"], p["nm_b"] = ln(H)
    p["qr_g"], p["qr_b"] = ln(H)
    p["it_ln_g"], p["it_ln_b"] = ln(Di)
    p["ur_ln_g"], p["ur_ln_b"] = ln(Du)
    p["nm_mlp_g"], p["nm_mlp_beta"] = ln(H)
    p["it_proj_g"], p["it_proj_b"] = ln(H)
    p["ur_proj_g"], p["ur_proj_b"] = ln(H)
    p["imp_ln_g"], p["imp_ln_b"] = ln(64)
    p["fus_ln1_g"], p["fus_ln1_b"] = ln(2 * H)
    p["fus_ln2_g"], p["fus_ln2_b"] = ln(H)

    # Linears (xavier_uniform weight, zero bias)
    p["nm_mlp_W"] = xavier(H, H)
    p["nm_mlp_b"] = jnp.zeros((1, H), jnp.float32)
    p["it_W"] = xavier(Di, H)
    p["it_b"] = jnp.zeros((1, H), jnp.float32)
    p["ur_W"] = xavier(Du, H)
    p["ur_b"] = jnp.zeros((1, H), jnp.float32)
    p["imp_W1"] = xavier(H, 64)
    p["imp_b1"] = jnp.zeros((1, 64), jnp.float32)
    p["imp_W2"] = xavier(64, 1)
    p["imp_b2"] = jnp.zeros((1, 1), jnp.float32)
    p["fus_W1"] = xavier(7 * H, 2 * H)
    p["fus_b1"] = jnp.zeros((1, 2 * H), jnp.float32)
    p["fus_W2"] = xavier(2 * H, H)
    p["fus_b2"] = jnp.zeros((1, H), jnp.float32)
    return p


# ----------------------------------------------------------------------------
if __name__ == "__main__":
    B, S, H = 2, 8, CONFIG["hidden_size"]

    key = jax.random.PRNGKey(0)
    k = jax.random.split(key, 8)
    event_types = jax.random.randint(k[0], (B, S), 0, 7)                  # exercises clamp
    categories = jax.random.randint(k[1], (B, S), 0, CONFIG["num_categories"] + 3)
    prices = jax.random.randint(k[2], (B, S), 0, 120)
    names = jax.random.randint(k[3], (B, S, 16), 0, 256).astype(jnp.float32)
    queries = jax.random.randint(k[4], (B, S, 16), 0, 256).astype(jnp.float32)
    timestamps = jax.random.uniform(k[5], (B, S), jnp.float32)
    item_ids = jax.random.randint(k[6], (B, S), 0, CONFIG["sku_hash_size"] + 20)
    urls = jax.random.randint(k[7], (B, S), -5, 200)

    params = init_params(jax.random.PRNGKey(42))

    fwd = jax.jit(enhanced_feature_encoder)
    out = fwd(params, event_types, categories, prices, names, queries,
              timestamps, item_ids, urls)
    out = jax.block_until_ready(out)
    assert out.shape == (B, S, H)
    assert bool(jnp.all(jnp.isfinite(out)))
    print("KERNEL_OK")
</pallas_src>

<mosaic_0001>
module attributes {stable_mosaic.version = 11 : i64} {
  func.func @encoder_kernel(%arg0: i32, %arg1: memref<5x8x32xf32, #tpu.memory_space<vmem>>, %arg2: memref<8x16xf32, #tpu.memory_space<vmem>>, %arg3: memref<8x16xf32, #tpu.memory_space<vmem>>, %arg4: memref<5x1x32xf32, #tpu.memory_space<vmem>>, %arg5: memref<5x1x32xf32, #tpu.memory_space<vmem>>, %arg6: memref<24x128xf32, #tpu.memory_space<vmem>>, %arg7: memref<64x96xbf16, #tpu.memory_space<vmem>>, %arg8: memref<224x448xbf16, #tpu.memory_space<vmem>>, %arg9: memref<7x224xbf16, #tpu.memory_space<vmem>>, %arg10: memref<224x64xbf16, #tpu.memory_space<vmem>>, %arg11: memref<64x32xbf16, #tpu.memory_space<vmem>>, %arg12: memref<8x32xf32, #tpu.memory_space<vmem>>) attributes {dimension_semantics = [#tpu.dimension_semantics<parallel>], iteration_bounds = array<i64: 2>, scalar_prefetch = 0 : i64, scratch_operands = 0 : i64, tpu.core_type = #tpu.core_type<tc>, window_params = [{transform_indices = @transform_0, window_bounds = array<i64: 5, 8, 32>}, {transform_indices = @transform_1, window_bounds = array<i64: 8, 16>}, {transform_indices = @transform_2, window_bounds = array<i64: 8, 16>}, {pipeline_mode = #tpu.pipeline_mode<synchronous>, transform_indices = @transform_3, window_bounds = array<i64: 5, 1, 32>}, {pipeline_mode = #tpu.pipeline_mode<synchronous>, transform_indices = @transform_4, window_bounds = array<i64: 5, 1, 32>}, {pipeline_mode = #tpu.pipeline_mode<synchronous>, transform_indices = @transform_5, window_bounds = array<i64: 24, 128>}, {pipeline_mode = #tpu.pipeline_mode<synchronous>, transform_indices = @transform_6, window_bounds = array<i64: 64, 96>}, {pipeline_mode = #tpu.pipeline_mode<synchronous>, transform_indices = @transform_7, window_bounds = array<i64: 224, 448>}, {pipeline_mode = #tpu.pipeline_mode<synchronous>, transform_indices = @transform_8, window_bounds = array<i64: 7, 224>}, {pipeline_mode = #tpu.pipeline_mode<synchronous>, transform_indices = @transform_9, window_bounds = array<i64: 224, 64>}, {pipeline_mode = #tpu.pipeline_mode<synchronous>, transform_indices = @transform_10, window_bounds = array<i64: 64, 32>}, {transform_indices = @transform_11, window_bounds = array<i64: 8, 32>}]} {
    %c0 = arith.constant 0 : index
    %c0_0 = arith.constant 0 : index
    %0 = vector.load %arg6[%c0, %c0_0] : memref<24x128xf32, #tpu.memory_space<vmem>>, vector<24x128xf32>
    %c0_1 = arith.constant 0 : index
    %c0_2 = arith.constant 0 : index
    %c0_3 = arith.constant 0 : index
    %1 = vector.load %arg1[%c0_1, %c0_2, %c0_3] : memref<5x8x32xf32, #tpu.memory_space<vmem>>, vector<5x8x32xf32>
    %c0_4 = arith.constant 0 : index
    %c0_5 = arith.constant 0 : index
    %c0_6 = arith.constant 0 : index
    %2 = vector.load %arg4[%c0_4, %c0_5, %c0_6] : memref<5x1x32xf32, #tpu.memory_space<vmem>>, vector<5x1x32xf32>
    %c0_7 = arith.constant 0 : index
    %c0_8 = arith.constant 0 : index
    %c0_9 = arith.constant 0 : index
    %3 = vector.load %arg5[%c0_7, %c0_8, %c0_9] : memref<5x1x32xf32, #tpu.memory_space<vmem>>, vector<5x1x32xf32>
    %cst = arith.constant dense<0.000000e+00> : vector<5x8xf32>
    %4 = vector.multi_reduction <add>, %1, %cst [2] : vector<5x8x32xf32> to vector<5x8xf32>
    %5 = vector.shape_cast %4 : vector<5x8xf32> to vector<5x8x1xf32>
    %cst_10 = arith.constant 3.200000e+01 : f32
    %6 = vector.broadcast %cst_10 : f32 to vector<5x8x1xf32>
    %7 = arith.divf %5, %6 : vector<5x8x1xf32>
    %8 = vector.broadcast %7 : vector<5x8x1xf32> to vector<5x8x32xf32>
    %9 = arith.subf %1, %8 : vector<5x8x32xf32>
    %10 = arith.mulf %9, %9 : vector<5x8x32xf32>
    %cst_11 = arith.constant dense<0.000000e+00> : vector<5x8xf32>
    %11 = vector.multi_reduction <add>, %10, %cst_11 [2] : vector<5x8x32xf32> to vector<5x8xf32>
    %12 = vector.shape_cast %11 : vector<5x8xf32> to vector<5x8x1xf32>
    %cst_12 = arith.constant 3.200000e+01 : f32
    %13 = vector.broadcast %cst_12 : f32 to vector<5x8x1xf32>
    %14 = arith.divf %12, %13 : vector<5x8x1xf32>
    %15 = vector.broadcast %7 : vector<5x8x1xf32> to vector<5x8x32xf32>
    %16 = arith.subf %1, %15 : vector<5x8x32xf32>
    %cst_13 = arith.constant 9.99999974E-6 : f32
    %17 = vector.broadcast %cst_13 : f32 to vector<5x8x1xf32>
    %18 = arith.addf %14, %17 : vector<5x8x1xf32>
    %19 = math.rsqrt %18 : vector<5x8x1xf32>
    %20 = vector.broadcast %19 : vector<5x8x1xf32> to vector<5x8x32xf32>
    %21 = arith.mulf %16, %20 : vector<5x8x32xf32>
    %22 = vector.broadcast %2 : vector<5x1x32xf32> to vector<5x8x32xf32>
    %23 = arith.mulf %21, %22 : vector<5x8x32xf32>
    %24 = vector.broadcast %3 : vector<5x1x32xf32> to vector<5x8x32xf32>
    %25 = arith.addf %23, %24 : vector<5x8x32xf32>
    %26 = vector.extract_strided_slice %25 {offsets = [0, 0, 0], sizes = [1, 8, 32], strides = [1, 1, 1]} : vector<5x8x32xf32> to vector<1x8x32xf32>
    %27 = vector.shape_cast %26 : vector<1x8x32xf32> to vector<8x32xf32>
    %28 = vector.extract_strided_slice %25 {offsets = [1, 0, 0], sizes = [1, 8, 32], strides = [1, 1, 1]} : vector<5x8x32xf32> to vector<1x8x32xf32>
    %29 = vector.shape_cast %28 : vector<1x8x32xf32> to vector<8x32xf32>
    %30 = vector.extract_strided_slice %25 {offsets = [2, 0, 0], sizes = [1, 8, 32], strides = [1, 1, 1]} : vector<5x8x32xf32> to vector<1x8x32xf32>
    %31 = vector.shape_cast %30 : vector<1x8x32xf32> to vector<8x32xf32>
    %32 = vector.extract_strided_slice %25 {offsets = [3, 0, 0], sizes = [1, 8, 32], strides = [1, 1, 1]} : vector<5x8x32xf32> to vector<1x8x32xf32>
    %33 = vector.shape_cast %32 : vector<1x8x32xf32> to vector<8x32xf32>
    %34 = vector.extract_strided_slice %25 {offsets = [4, 0, 0], sizes = [1, 8, 32], strides = [1, 1, 1]} : vector<5x8x32xf32> to vector<1x8x32xf32>
    %35 = vector.shape_cast %34 : vector<1x8x32xf32> to vector<8x32xf32>
    %c0_14 = arith.constant 0 : index
    %c0_15 = arith.constant 0 : index
    %36 = vector.load %arg2[%c0_14, %c0_15] : memref<8x16xf32, #tpu.memory_space<vmem>>, vector<8x16xf32>
    %37 = vector.extract_strided_slice %0 {offsets = [0, 0], sizes = [1, 16], strides = [1, 1]} : vector<24x128xf32> to vector<1x16xf32>
    %38 = vector.extract_strided_slice %0 {offsets = [1, 0], sizes = [1, 16], strides = [1, 1]} : vector<24x128xf32> to vector<1x16xf32>
    %cst_16 = arith.constant dense<0.000000e+00> : vector<8xf32>
    %39 = vector.multi_reduction <add>, %36, %cst_16 [1] : vector<8x16xf32> to vector<8xf32>
    %40 = vector.shape_cast %39 : vector<8xf32> to vector<8x1xf32>
    %cst_17 = arith.constant 1.600000e+01 : f32
    %41 = vector.broadcast %cst_17 : f32 to vector<8x1xf32>
    %42 = arith.divf %40, %41 : vector<8x1xf32>
    %43 = vector.broadcast %42 : vector<8x1xf32> to vector<8x16xf32>
    %44 = arith.subf %36, %43 : vector<8x16xf32>
    %45 = arith.mulf %44, %44 : vector<8x16xf32>
    %cst_18 = arith.constant dense<0.000000e+00> : vector<8xf32>
    %46 = vector.multi_reduction <add>, %45, %cst_18 [1] : vector<8x16xf32> to vector<8xf32>
    %47 = vector.shape_cast %46 : vector<8xf32> to vector<8x1xf32>
    %cst_19 = arith.constant 1.600000e+01 : f32
    %48 = vector.broadcast %cst_19 : f32 to vector<8x1xf32>
    %49 = arith.divf %47, %48 : vector<8x1xf32>
    %50 = vector.broadcast %42 : vector<8x1xf32> to vector<8x16xf32>
    %51 = arith.subf %36, %50 : vector<8x16xf32>
    %cst_20 = arith.constant 9.99999974E-6 : f32
    %52 = vector.broadcast %cst_20 : f32 to vector<8x1xf32>
    %53 = arith.addf %49, %52 : vector<8x1xf32>
    %54 = math.rsqrt %53 : vector<8x1xf32>
    %55 = vector.broadcast %54 : vector<8x1xf32> to vector<8x16xf32>
    %56 = arith.mulf %51, %55 : vector<8x16xf32>
    %57 = vector.broadcast %37 : vector<1x16xf32> to vector<8x16xf32>
    %58 = arith.mulf %56, %57 : vector<8x16xf32>
    %59 = vector.broadcast %38 : vector<1x16xf32> to vector<8x16xf32>
    %60 = arith.addf %58, %59 : vector<8x16xf32>
    %c0_21 = arith.constant 0 : index
    %c0_22 = arith.constant 0 : index
    %61 = vector.load %arg3[%c0_21, %c0_22] : memref<8x16xf32, #tpu.memory_space<vmem>>, vector<8x16xf32>
    %62 = vector.extract_strided_slice %0 {offsets = [2, 0], sizes = [1, 16], strides = [1, 1]} : vector<24x128xf32> to vector<1x16xf32>
    %63 = vector.extract_strided_slice %0 {offsets = [3, 0], sizes = [1, 16], strides = [1, 1]} : vector<24x128xf32> to vector<1x16xf32>
    %cst_23 = arith.constant dense<0.000000e+00> : vector<8xf32>
    %64 = vector.multi_reduction <add>, %61, %cst_23 [1] : vector<8x16xf32> to vector<8xf32>
    %65 = vector.shape_cast %64 : vector<8xf32> to vector<8x1xf32>
    %cst_24 = arith.constant 1.600000e+01 : f32
    %66 = vector.broadcast %cst_24 : f32 to vector<8x1xf32>
    %67 = arith.divf %65, %66 : vector<8x1xf32>
    %68 = vector.broadcast %67 : vector<8x1xf32> to vector<8x16xf32>
    %69 = arith.subf %61, %68 : vector<8x16xf32>
    %70 = arith.mulf %69, %69 : vector<8x16xf32>
    %cst_25 = arith.constant dense<0.000000e+00> : vector<8xf32>
    %71 = vector.multi_reduction <add>, %70, %cst_25 [1] : vector<8x16xf32> to vector<8xf32>
    %72 = vector.shape_cast %71 : vector<8xf32> to vector<8x1xf32>
    %cst_26 = arith.constant 1.600000e+01 : f32
    %73 = vector.broadcast %cst_26 : f32 to vector<8x1xf32>
    %74 = arith.divf %72, %73 : vector<8x1xf32>
    %75 = vector.broadcast %67 : vector<8x1xf32> to vector<8x16xf32>
    %76 = arith.subf %61, %75 : vector<8x16xf32>
    %cst_27 = arith.constant 9.99999974E-6 : f32
    %77 = vector.broadcast %cst_27 : f32 to vector<8x1xf32>
    %78 = arith.addf %74, %77 : vector<8x1xf32>
    %79 = math.rsqrt %78 : vector<8x1xf32>
    %80 = vector.broadcast %79 : vector<8x1xf32> to vector<8x16xf32>
    %81 = arith.mulf %76, %80 : vector<8x16xf32>
    %82 = vector.broadcast %62 : vector<1x16xf32> to vector<8x16xf32>
    %83 = arith.mulf %81, %82 : vector<8x16xf32>
    %84 = vector.broadcast %63 : vector<1x16xf32> to vector<8x16xf32>
    %85 = arith.addf %83, %84 : vector<8x16xf32>
    %86 = tpu.concatenate %33, %60, %85 in 1 : vector<8x32xf32>, vector<8x16xf32>, vector<8x16xf32> -> vector<8x64xf32>
    %87 = arith.truncf %86 : vector<8x64xf32> to vector<8x64xbf16>
    %c0_28 = arith.constant 0 : index
    %c0_29 = arith.constant 0 : index
    %88 = vector.load %arg7[%c0_28, %c0_29] : memref<64x96xbf16, #tpu.memory_space<vmem>>, vector<64x96xbf16>
    %cst_30 = arith.constant dense<0.000000e+00> : vector<8x96xf32>
    %89 = tpu.matmul %87, %88, %cst_30 {dimension_numbers = #tpu.dot_dimension_numbers<[1], [0], [0], [1], [0, 0, 1, 1], [], []>} : vector<8x64xbf16>, vector<64x96xbf16>, vector<8x96xf32> -> vector<8x96xf32>
    %90 = vector.extract_strided_slice %0 {offsets = [4, 0], sizes = [1, 96], strides = [1, 1]} : vector<24x128xf32> to vector<1x96xf32>
    %91 = vector.broadcast %90 : vector<1x96xf32> to vector<8x96xf32>
    %92 = arith.addf %89, %91 : vector<8x96xf32>
    %93 = vector.extract_strided_slice %92 {offsets = [0, 0], sizes = [8, 32], strides = [1, 1]} : vector<8x96xf32> to vector<8x32xf32>
    %94 = vector.extract_strided_slice %92 {offsets = [0, 32], sizes = [8, 32], strides = [1, 1]} : vector<8x96xf32> to vector<8x32xf32>
    %95 = vector.extract_strided_slice %92 {offsets = [0, 64], sizes = [8, 32], strides = [1, 1]} : vector<8x96xf32> to vector<8x32xf32>
    %cst_31 = arith.constant 0.000000e+00 : f32
    %96 = vector.broadcast %cst_31 : f32 to vector<8x32xf32>
    %97 = arith.maximumf %93, %96 : vector<8x32xf32>
    %98 = vector.extract_strided_slice %0 {offsets = [5, 0], sizes = [1, 32], strides = [1, 1]} : vector<24x128xf32> to vector<1x32xf32>
    %99 = vector.extract_strided_slice %0 {offsets = [6, 0], sizes = [1, 32], strides = [1, 1]} : vector<24x128xf32> to vector<1x32xf32>
    %cst_32 = arith.constant dense<0.000000e+00> : vector<8xf32>
    %100 = vector.multi_reduction <add>, %97, %cst_32 [1] : vector<8x32xf32> to vector<8xf32>
    %101 = vector.shape_cast %100 : vector<8xf32> to vector<8x1xf32>
    %cst_33 = arith.constant 3.200000e+01 : f32
    %102 = vector.broadcast %cst_33 : f32 to vector<8x1xf32>
    %103 = arith.divf %101, %102 : vector<8x1xf32>
    %104 = vector.broadcast %103 : vector<8x1xf32> to vector<8x32xf32>
    %105 = arith.subf %97, %104 : vector<8x32xf32>
    %106 = arith.mulf %105, %105 : vector<8x32xf32>
    %cst_34 = arith.constant dense<0.000000e+00> : vector<8xf32>
    %107 = vector.multi_reduction <add>, %106, %cst_34 [1] : vector<8x32xf32> to vector<8xf32>
    %108 = vector.shape_cast %107 : vector<8xf32> to vector<8x1xf32>
    %cst_35 = arith.constant 3.200000e+01 : f32
    %109 = vector.broadcast %cst_35 : f32 to vector<8x1xf32>
    %110 = arith.divf %108, %109 : vector<8x1xf32>
    %111 = vector.broadcast %103 : vector<8x1xf32> to vector<8x32xf32>
    %112 = arith.subf %97, %111 : vector<8x32xf32>
    %cst_36 = arith.constant 9.99999974E-6 : f32
    %113 = vector.broadcast %cst_36 : f32 to vector<8x1xf32>
    %114 = arith.addf %110, %113 : vector<8x1xf32>
    %115 = math.rsqrt %114 : vector<8x1xf32>
    %116 = vector.broadcast %115 : vector<8x1xf32> to vector<8x32xf32>
    %117 = arith.mulf %112, %116 : vector<8x32xf32>
    %118 = vector.broadcast %98 : vector<1x32xf32> to vector<8x32xf32>
    %119 = arith.mulf %117, %118 : vector<8x32xf32>
    %120 = vector.broadcast %99 : vector<1x32xf32> to vector<8x32xf32>
    %121 = arith.addf %119, %120 : vector<8x32xf32>
    %122 = vector.extract_strided_slice %0 {offsets = [7, 0], sizes = [1, 32], strides = [1, 1]} : vector<24x128xf32> to vector<1x32xf32>
    %123 = vector.extract_strided_slice %0 {offsets = [8, 0], sizes = [1, 32], strides = [1, 1]} : vector<24x128xf32> to vector<1x32xf32>
    %cst_37 = arith.constant dense<0.000000e+00> : vector<8xf32>
    %124 = vector.multi_reduction <add>, %94, %cst_37 [1] : vector<8x32xf32> to vector<8xf32>
    %125 = vector.shape_cast %124 : vector<8xf32> to vector<8x1xf32>
    %cst_38 = arith.constant 3.200000e+01 : f32
    %126 = vector.broadcast %cst_38 : f32 to vector<8x1xf32>
    %127 = arith.divf %125, %126 : vector<8x1xf32>
    %128 = vector.broadcast %127 : vector<8x1xf32> to vector<8x32xf32>
    %129 = arith.subf %94, %128 : vector<8x32xf32>
    %130 = arith.mulf %129, %129 : vector<8x32xf32>
    %cst_39 = arith.constant dense<0.000000e+00> : vector<8xf32>
    %131 = vector.multi_reduction <add>, %130, %cst_39 [1] : vector<8x32xf32> to vector<8xf32>
    %132 = vector.shape_cast %131 : vector<8xf32> to vector<8x1xf32>
    %cst_40 = arith.constant 3.200000e+01 : f32
    %133 = vector.broadcast %cst_40 : f32 to vector<8x1xf32>
    %134 = arith.divf %132, %133 : vector<8x1xf32>
    %135 = vector.broadcast %127 : vector<8x1xf32> to vector<8x32xf32>
    %136 = arith.subf %94, %135 : vector<8x32xf32>
    %cst_41 = arith.constant 9.99999974E-6 : f32
    %137 = vector.broadcast %cst_41 : f32 to vector<8x1xf32>
    %138 = arith.addf %134, %137 : vector<8x1xf32>
    %139 = math.rsqrt %138 : vector<8x1xf32>
    %140 = vector.broadcast %139 : vector<8x1xf32> to vector<8x32xf32>
    %141 = arith.mulf %136, %140 : vector<8x32xf32>
    %142 = vector.broadcast %122 : vector<1x32xf32> to vector<8x32xf32>
    %143 = arith.mulf %141, %142 : vector<8x32xf32>
    %144 = vector.broadcast %123 : vector<1x32xf32> to vector<8x32xf32>
    %145 = arith.addf %143, %144 : vector<8x32xf32>
    %cst_42 = arith.constant 0.000000e+00 : f32
    %146 = vector.broadcast %cst_42 : f32 to vector<8x32xf32>
    %147 = arith.maximumf %145, %146 : vector<8x32xf32>
    %148 = vector.extract_strided_slice %0 {offsets = [9, 0], sizes = [1, 32], strides = [1, 1]} : vector<24x128xf32> to vector<1x32xf32>
    %149 = vector.extract_strided_slice %0 {offsets = [10, 0], sizes = [1, 32], strides = [1, 1]} : vector<24x128xf32> to vector<1x32xf32>
    %cst_43 = arith.constant dense<0.000000e+00> : vector<8xf32>
    %150 = vector.multi_reduction <add>, %95, %cst_43 [1] : vector<8x32xf32> to vector<8xf32>
    %151 = vector.shape_cast %150 : vector<8xf32> to vector<8x1xf32>
    %cst_44 = arith.constant 3.200000e+01 : f32
    %152 = vector.broadcast %cst_44 : f32 to vector<8x1xf32>
    %153 = arith.divf %151, %152 : vector<8x1xf32>
    %154 = vector.broadcast %153 : vector<8x1xf32> to vector<8x32xf32>
    %155 = arith.subf %95, %154 : vector<8x32xf32>
    %156 = arith.mulf %155, %155 : vector<8x32xf32>
    %cst_45 = arith.constant dense<0.000000e+00> : vector<8xf32>
    %157 = vector.multi_reduction <add>, %156, %cst_45 [1] : vector<8x32xf32> to vector<8xf32>
    %158 = vector.shape_cast %157 : vector<8xf32> to vector<8x1xf32>
    %cst_46 = arith.constant 3.200000e+01 : f32
    %159 = vector.broadcast %cst_46 : f32 to vector<8x1xf32>
    %160 = arith.divf %158, %159 : vector<8x1xf32>
    %161 = vector.broadcast %153 : vector<8x1xf32> to vector<8x32xf32>
    %162 = arith.subf %95, %161 : vector<8x32xf32>
    %cst_47 = arith.constant 9.99999974E-6 : f32
    %163 = vector.broadcast %cst_47 : f32 to vector<8x1xf32>
    %164 = arith.addf %160, %163 : vector<8x1xf32>
    %165 = math.rsqrt %164 : vector<8x1xf32>
    %166 = vector.broadcast %165 : vector<8x1xf32> to vector<8x32xf32>
    %167 = arith.mulf %162, %166 : vector<8x32xf32>
    %168 = vector.broadcast %148 : vector<1x32xf32> to vector<8x32xf32>
    %169 = arith.mulf %167, %168 : vector<8x32xf32>
    %170 = vector.broadcast %149 : vector<1x32xf32> to vector<8x32xf32>
    %171 = arith.addf %169, %170 : vector<8x32xf32>
    %cst_48 = arith.constant 0.000000e+00 : f32
    %172 = vector.broadcast %cst_48 : f32 to vector<8x32xf32>
    %173 = arith.maximumf %171, %172 : vector<8x32xf32>
    %174 = arith.mulf %27, %27 : vector<8x32xf32>
    %cst_49 = arith.constant dense<0.000000e+00> : vector<8xf32>
    %175 = vector.multi_reduction <add>, %174, %cst_49 [1] : vector<8x32xf32> to vector<8xf32>
    %176 = vector.shape_cast %175 : vector<8xf32> to vector<8x1xf32>
    %cst_50 = arith.constant 1.000000e-24 : f32
    %177 = vector.broadcast %cst_50 : f32 to vector<8x1xf32>
    %178 = arith.maximumf %176, %177 : vector<8x1xf32>
    %179 = math.rsqrt %178 : vector<8x1xf32>
    %180 = vector.broadcast %179 : vector<8x1xf32> to vector<8x32xf32>
    %181 = arith.mulf %27, %180 : vector<8x32xf32>
    %182 = arith.mulf %178, %179 : vector<8x1xf32>
    %183 = arith.mulf %29, %29 : vector<8x32xf32>
    %cst_51 = arith.constant dense<0.000000e+00> : vector<8xf32>
    %184 = vector.multi_reduction <add>, %183, %cst_51 [1] : vector<8x32xf32> to vector<8xf32>
    %185 = vector.shape_cast %184 : vector<8xf32> to vector<8x1xf32>
    %cst_52 = arith.constant 1.000000e-24 : f32
    %186 = vector.broadcast %cst_52 : f32 to vector<8x1xf32>
    %187 = arith.maximumf %185, %186 : vector<8x1xf32>
    %188 = math.rsqrt %187 : vector<8x1xf32>
    %189 = vector.broadcast %188 : vector<8x1xf32> to vector<8x32xf32>
    %190 = arith.mulf %29, %189 : vector<8x32xf32>
    %191 = arith.mulf %187, %188 : vector<8x1xf32>
    %192 = arith.mulf %31, %31 : vector<8x32xf32>
    %cst_53 = arith.constant dense<0.000000e+00> : vector<8xf32>
    %193 = vector.multi_reduction <add>, %192, %cst_53 [1] : vector<8x32xf32> to vector<8xf32>
    %194 = vector.shape_cast %193 : vector<8xf32> to vector<8x1xf32>
    %cst_54 = arith.constant 1.000000e-24 : f32
    %195 = vector.broadcast %cst_54 : f32 to vector<8x1xf32>
    %196 = arith.maximumf %194, %195 : vector<8x1xf32>
    %197 = math.rsqrt %196 : vector<8x1xf32>
    %198 = vector.broadcast %197 : vector<8x1xf32> to vector<8x32xf32>
    %199 = arith.mulf %31, %198 : vector<8x32xf32>
    %200 = arith.mulf %196, %197 : vector<8x1xf32>
    %201 = arith.mulf %121, %121 : vector<8x32xf32>
    %cst_55 = arith.constant dense<0.000000e+00> : vector<8xf32>
    %202 = vector.multi_reduction <add>, %201, %cst_55 [1] : vector<8x32xf32> to vector<8xf32>
    %203 = vector.shape_cast %202 : vector<8xf32> to vector<8x1xf32>
    %cst_56 = arith.constant 1.000000e-24 : f32
    %204 = vector.broadcast %cst_56 : f32 to vector<8x1xf32>
    %205 = arith.maximumf %203, %204 : vector<8x1xf32>
    %206 = math.rsqrt %205 : vector<8x1xf32>
    %207 = vector.broadcast %206 : vector<8x1xf32> to vector<8x32xf32>
    %208 = arith.mulf %121, %207 : vector<8x32xf32>
    %209 = arith.mulf %205, %206 : vector<8x1xf32>
    %210 = arith.mulf %35, %35 : vector<8x32xf32>
    %cst_57 = arith.constant dense<0.000000e+00> : vector<8xf32>
    %211 = vector.multi_reduction <add>, %210, %cst_57 [1] : vector<8x32xf32> to vector<8xf32>
    %212 = vector.shape_cast %211 : vector<8xf32> to vector<8x1xf32>
    %cst_58 = arith.constant 1.000000e-24 : f32
    %213 = vector.broadcast %cst_58 : f32 to vector<8x1xf32>
    %214 = arith.maximumf %212, %213 : vector<8x1xf32>
    %215 = math.rsqrt %214 : vector<8x1xf32>
    %216 = vector.broadcast %215 : vector<8x1xf32> to vector<8x32xf32>
    %217 = arith.mulf %35, %216 : vector<8x32xf32>
    %218 = arith.mulf %214, %215 : vector<8x1xf32>
    %219 = arith.mulf %147, %147 : vector<8x32xf32>
    %cst_59 = arith.constant dense<0.000000e+00> : vector<8xf32>
    %220 = vector.multi_reduction <add>, %219, %cst_59 [1] : vector<8x32xf32> to vector<8xf32>
    %221 = vector.shape_cast %220 : vector<8xf32> to vector<8x1xf32>
    %cst_60 = arith.constant 1.000000e-24 : f32
    %222 = vector.broadcast %cst_60 : f32 to vector<8x1xf32>
    %223 = arith.maximumf %221, %222 : vector<8x1xf32>
    %224 = math.rsqrt %223 : vector<8x1xf32>
    %225 = vector.broadcast %224 : vector<8x1xf32> to vector<8x32xf32>
    %226 = arith.mulf %147, %225 : vector<8x32xf32>
    %227 = arith.mulf %223, %224 : vector<8x1xf32>
    %228 = arith.mulf %173, %173 : vector<8x32xf32>
    %cst_61 = arith.constant dense<0.000000e+00> : vector<8xf32>
    %229 = vector.multi_reduction <add>, %228, %cst_61 [1] : vector<8x32xf32> to vector<8xf32>
    %230 = vector.shape_cast %229 : vector<8xf32> to vector<8x1xf32>
    %cst_62 = arith.constant 1.000000e-24 : f32
    %231 = vector.broadcast %cst_62 : f32 to vector<8x1xf32>
    %232 = arith.maximumf %230, %231 : vector<8x1xf32>
    %233 = math.rsqrt %232 : vector<8x1xf32>
    %234 = vector.broadcast %233 : vector<8x1xf32> to vector<8x32xf32>
    %235 = arith.mulf %173, %234 : vector<8x32xf32>
    %236 = arith.mulf %232, %233 : vector<8x1xf32>
    %237 = tpu.concatenate %181, %190, %199, %208, %217, %226, %235 in 1 : vector<8x32xf32>, vector<8x32xf32>, vector<8x32xf32>, vector<8x32xf32>, vector<8x32xf32>, vector<8x32xf32>, vector<8x32xf32> -> vector<8x224xf32>
    %238 = tpu.concatenate %182, %191, %200, %209, %218, %227, %236 in 1 : vector<8x1xf32>, vector<8x1xf32>, vector<8x1xf32>, vector<8x1xf32>, vector<8x1xf32>, vector<8x1xf32>, vector<8x1xf32> -> vector<8x7xf32>
    %239 = arith.truncf %237 : vector<8x224xf32> to vector<8x224xbf16>
    %c0_63 = arith.constant 0 : index
    %c0_64 = arith.constant 0 : index
    %240 = vector.load %arg8[%c0_63, %c0_64] : memref<224x448xbf16, #tpu.memory_space<vmem>>, vector<224x448xbf16>
    %cst_65 = arith.constant dense<0.000000e+00> : vector<8x448xf32>
    %241 = tpu.matmul %239, %240, %cst_65 {dimension_numbers = #tpu.dot_dimension_numbers<[1], [0], [0], [1], [0, 0, 1, 1], [], []>} : vector<8x224xbf16>, vector<224x448xbf16>, vector<8x448xf32> -> vector<8x448xf32>
    %242 = vector.extract_strided_slice %0 {offsets = [11, 0], sizes = [1, 64], strides = [1, 1]} : vector<24x128xf32> to vector<1x64xf32>
    %243 = vector.extract_strided_slice %0 {offsets = [12, 0], sizes = [1, 64], strides = [1, 1]} : vector<24x128xf32> to vector<1x64xf32>
    %244 = vector.extract_strided_slice %0 {offsets = [13, 0], sizes = [1, 64], strides = [1, 1]} : vector<24x128xf32> to vector<1x64xf32>
    %245 = vector.extract_strided_slice %0 {offsets = [14, 0], sizes = [1, 64], strides = [1, 1]} : vector<24x128xf32> to vector<1x64xf32>
    %246 = vector.extract_strided_slice %0 {offsets = [15, 0], sizes = [1, 1], strides = [1, 1]} : vector<24x128xf32> to vector<1x1xf32>
    %247 = vector.extract_strided_slice %241 {offsets = [0, 0], sizes = [8, 64], strides = [1, 1]} : vector<8x448xf32> to vector<8x64xf32>
    %248 = vector.broadcast %242 : vector<1x64xf32> to vector<8x64xf32>
    %249 = arith.addf %247, %248 : vector<8x64xf32>
    %cst_66 = arith.constant dense<0.000000e+00> : vector<8xf32>
    %250 = vector.multi_reduction <add>, %249, %cst_66 [1] : vector<8x64xf32> to vector<8xf32>
    %251 = vector.shape_cast %250 : vector<8xf32> to vector<8x1xf32>
    %cst_67 = arith.constant 6.400000e+01 : f32
    %252 = vector.broadcast %cst_67 : f32 to vector<8x1xf32>
    %253 = arith.divf %251, %252 : vector<8x1xf32>
    %254 = vector.broadcast %253 : vector<8x1xf32> to vector<8x64xf32>
    %255 = arith.subf %249, %254 : vector<8x64xf32>
    %256 = arith.mulf %255, %255 : vector<8x64xf32>
    %cst_68 = arith.constant dense<0.000000e+00> : vector<8xf32>
    %257 = vector.multi_reduction <add>, %256, %cst_68 [1] : vector<8x64xf32> to vector<8xf32>
    %258 = vector.shape_cast %257 : vector<8xf32> to vector<8x1xf32>
    %cst_69 = arith.constant 6.400000e+01 : f32
    %259 = vector.broadcast %cst_69 : f32 to vector<8x1xf32>
    %260 = arith.divf %258, %259 : vector<8x1xf32>
    %261 = vector.broadcast %253 : vector<8x1xf32> to vector<8x64xf32>
    %262 = arith.subf %249, %261 : vector<8x64xf32>
    %cst_70 = arith.constant 9.99999974E-6 : f32
    %263 = vector.broadcast %cst_70 : f32 to vector<8x1xf32>
    %264 = arith.addf %260, %263 : vector<8x1xf32>
    %265 = math.rsqrt %264 : vector<8x1xf32>
    %266 = vector.broadcast %265 : vector<8x1xf32> to vector<8x64xf32>
    %267 = arith.mulf %262, %266 : vector<8x64xf32>
    %268 = vector.broadcast %243 : vector<1x64xf32> to vector<8x64xf32>
    %269 = arith.mulf %267, %268 : vector<8x64xf32>
    %270 = vector.broadcast %244 : vector<1x64xf32> to vector<8x64xf32>
    %271 = arith.addf %269, %270 : vector<8x64xf32>
    %cst_71 = arith.constant 0.000000e+00 : f32
    %272 = vector.broadcast %cst_71 : f32 to vector<8x64xf32>
    %273 = arith.maximumf %271, %272 : vector<8x64xf32>
    %274 = vector.broadcast %245 : vector<1x64xf32> to vector<8x64xf32>
    %275 = arith.mulf %273, %274 : vector<8x64xf32>
    %cst_72 = arith.constant dense<0.000000e+00> : vector<8xf32>
    %276 = vector.multi_reduction <add>, %275, %cst_72 [1] : vector<8x64xf32> to vector<8xf32>
    %277 = vector.shape_cast %276 : vector<8xf32> to vector<8x1xf32>
    %278 = vector.extract_strided_slice %241 {offsets = [0, 64], sizes = [8, 64], strides = [1, 1]} : vector<8x448xf32> to vector<8x64xf32>
    %279 = vector.broadcast %242 : vector<1x64xf32> to vector<8x64xf32>
    %280 = arith.addf %278, %279 : vector<8x64xf32>
    %cst_73 = arith.constant dense<0.000000e+00> : vector<8xf32>
    %281 = vector.multi_reduction <add>, %280, %cst_73 [1] : vector<8x64xf32> to vector<8xf32>
    %282 = vector.shape_cast %281 : vector<8xf32> to vector<8x1xf32>
    %cst_74 = arith.constant 6.400000e+01 : f32
    %283 = vector.broadcast %cst_74 : f32 to vector<8x1xf32>
    %284 = arith.divf %282, %283 : vector<8x1xf32>
    %285 = vector.broadcast %284 : vector<8x1xf32> to vector<8x64xf32>
    %286 = arith.subf %280, %285 : vector<8x64xf32>
    %287 = arith.mulf %286, %286 : vector<8x64xf32>
    %cst_75 = arith.constant dense<0.000000e+00> : vector<8xf32>
    %288 = vector.multi_reduction <add>, %287, %cst_75 [1] : vector<8x64xf32> to vector<8xf32>
    %289 = vector.shape_cast %288 : vector<8xf32> to vector<8x1xf32>
    %cst_76 = arith.constant 6.400000e+01 : f32
    %290 = vector.broadcast %cst_76 : f32 to vector<8x1xf32>
    %291 = arith.divf %289, %290 : vector<8x1xf32>
    %292 = vector.broadcast %284 : vector<8x1xf32> to vector<8x64xf32>
    %293 = arith.subf %280, %292 : vector<8x64xf32>
    %cst_77 = arith.constant 9.99999974E-6 : f32
    %294 = vector.broadcast %cst_77 : f32 to vector<8x1xf32>
    %295 = arith.addf %291, %294 : vector<8x1xf32>
    %296 = math.rsqrt %295 : vector<8x1xf32>
    %297 = vector.broadcast %296 : vector<8x1xf32> to vector<8x64xf32>
    %298 = arith.mulf %293, %297 : vector<8x64xf32>
    %299 = vector.broadcast %243 : vector<1x64xf32> to vector<8x64xf32>
    %300 = arith.mulf %298, %299 : vector<8x64xf32>
    %301 = vector.broadcast %244 : vector<1x64xf32> to vector<8x64xf32>
    %302 = arith.addf %300, %301 : vector<8x64xf32>
    %cst_78 = arith.constant 0.000000e+00 : f32
    %303 = vector.broadcast %cst_78 : f32 to vector<8x64xf32>
    %304 = arith.maximumf %302, %303 : vector<8x64xf32>
    %305 = vector.broadcast %245 : vector<1x64xf32> to vector<8x64xf32>
    %306 = arith.mulf %304, %305 : vector<8x64xf32>
    %cst_79 = arith.constant dense<0.000000e+00> : vector<8xf32>
    %307 = vector.multi_reduction <add>, %306, %cst_79 [1] : vector<8x64xf32> to vector<8xf32>
    %308 = vector.shape_cast %307 : vector<8xf32> to vector<8x1xf32>
    %309 = vector.extract_strided_slice %241 {offsets = [0, 128], sizes = [8, 64], strides = [1, 1]} : vector<8x448xf32> to vector<8x64xf32>
    %310 = vector.broadcast %242 : vector<1x64xf32> to vector<8x64xf32>
    %311 = arith.addf %309, %310 : vector<8x64xf32>
    %cst_80 = arith.constant dense<0.000000e+00> : vector<8xf32>
    %312 = vector.multi_reduction <add>, %311, %cst_80 [1] : vector<8x64xf32> to vector<8xf32>
    %313 = vector.shape_cast %312 : vector<8xf32> to vector<8x1xf32>
    %cst_81 = arith.constant 6.400000e+01 : f32
    %314 = vector.broadcast %cst_81 : f32 to vector<8x1xf32>
    %315 = arith.divf %313, %314 : vector<8x1xf32>
    %316 = vector.broadcast %315 : vector<8x1xf32> to vector<8x64xf32>
    %317 = arith.subf %311, %316 : vector<8x64xf32>
    %318 = arith.mulf %317, %317 : vector<8x64xf32>
    %cst_82 = arith.constant dense<0.000000e+00> : vector<8xf32>
    %319 = vector.multi_reduction <add>, %318, %cst_82 [1] : vector<8x64xf32> to vector<8xf32>
    %320 = vector.shape_cast %319 : vector<8xf32> to vector<8x1xf32>
    %cst_83 = arith.constant 6.400000e+01 : f32
    %321 = vector.broadcast %cst_83 : f32 to vector<8x1xf32>
    %322 = arith.divf %320, %321 : vector<8x1xf32>
    %323 = vector.broadcast %315 : vector<8x1xf32> to vector<8x64xf32>
    %324 = arith.subf %311, %323 : vector<8x64xf32>
    %cst_84 = arith.constant 9.99999974E-6 : f32
    %325 = vector.broadcast %cst_84 : f32 to vector<8x1xf32>
    %326 = arith.addf %322, %325 : vector<8x1xf32>
    %327 = math.rsqrt %326 : vector<8x1xf32>
    %328 = vector.broadcast %327 : vector<8x1xf32> to vector<8x64xf32>
    %329 = arith.mulf %324, %328 : vector<8x64xf32>
    %330 = vector.broadcast %243 : vector<1x64xf32> to vector<8x64xf32>
    %331 = arith.mulf %329, %330 : vector<8x64xf32>
    %332 = vector.broadcast %244 : vector<1x64xf32> to vector<8x64xf32>
    %333 = arith.addf %331, %332 : vector<8x64xf32>
    %cst_85 = arith.constant 0.000000e+00 : f32
    %334 = vector.broadcast %cst_85 : f32 to vector<8x64xf32>
    %335 = arith.maximumf %333, %334 : vector<8x64xf32>
    %336 = vector.broadcast %245 : vector<1x64xf32> to vector<8x64xf32>
    %337 = arith.mulf %335, %336 : vector<8x64xf32>
    %cst_86 = arith.constant dense<0.000000e+00> : vector<8xf32>
    %338 = vector.multi_reduction <add>, %337, %cst_86 [1] : vector<8x64xf32> to vector<8xf32>
    %339 = vector.shape_cast %338 : vector<8xf32> to vector<8x1xf32>
    %340 = vector.extract_strided_slice %241 {offsets = [0, 192], sizes = [8, 64], strides = [1, 1]} : vector<8x448xf32> to vector<8x64xf32>
    %341 = vector.broadcast %242 : vector<1x64xf32> to vector<8x64xf32>
    %342 = arith.addf %340, %341 : vector<8x64xf32>
    %cst_87 = arith.constant dense<0.000000e+00> : vector<8xf32>
    %343 = vector.multi_reduction <add>, %342, %cst_87 [1] : vector<8x64xf32> to vector<8xf32>
    %344 = vector.shape_cast %343 : vector<8xf32> to vector<8x1xf32>
    %cst_88 = arith.constant 6.400000e+01 : f32
    %345 = vector.broadcast %cst_88 : f32 to vector<8x1xf32>
    %346 = arith.divf %344, %345 : vector<8x1xf32>
    %347 = vector.broadcast %346 : vector<8x1xf32> to vector<8x64xf32>
    %348 = arith.subf %342, %347 : vector<8x64xf32>
    %349 = arith.mulf %348, %348 : vector<8x64xf32>
    %cst_89 = arith.constant dense<0.000000e+00> : vector<8xf32>
    %350 = vector.multi_reduction <add>, %349, %cst_89 [1] : vector<8x64xf32> to vector<8xf32>
    %351 = vector.shape_cast %350 : vector<8xf32> to vector<8x1xf32>
    %cst_90 = arith.constant 6.400000e+01 : f32
    %352 = vector.broadcast %cst_90 : f32 to vector<8x1xf32>
    %353 = arith.divf %351, %352 : vector<8x1xf32>
    %354 = vector.broadcast %346 : vector<8x1xf32> to vector<8x64xf32>
    %355 = arith.subf %342, %354 : vector<8x64xf32>
    %cst_91 = arith.constant 9.99999974E-6 : f32
    %356 = vector.broadcast %cst_91 : f32 to vector<8x1xf32>
    %357 = arith.addf %353, %356 : vector<8x1xf32>
    %358 = math.rsqrt %357 : vector<8x1xf32>
    %359 = vector.broadcast %358 : vector<8x1xf32> to vector<8x64xf32>
    %360 = arith.mulf %355, %359 : vector<8x64xf32>
    %361 = vector.broadcast %243 : vector<1x64xf32> to vector<8x64xf32>
    %362 = arith.mulf %360, %361 : vector<8x64xf32>
    %363 = vector.broadcast %244 : vector<1x64xf32> to vector<8x64xf32>
    %364 = arith.addf %362, %363 : vector<8x64xf32>
    %cst_92 = arith.constant 0.000000e+00 : f32
    %365 = vector.broadcast %cst_92 : f32 to vector<8x64xf32>
    %366 = arith.maximumf %364, %365 : vector<8x64xf32>
    %367 = vector.broadcast %245 : vector<1x64xf32> to vector<8x64xf32>
    %368 = arith.mulf %366, %367 : vector<8x64xf32>
    %cst_93 = arith.constant dense<0.000000e+00> : vector<8xf32>
    %369 = vector.multi_reduction <add>, %368, %cst_93 [1] : vector<8x64xf32> to vector<8xf32>
    %370 = vector.shape_cast %369 : vector<8xf32> to vector<8x1xf32>
    %371 = vector.extract_strided_slice %241 {offsets = [0, 256], sizes = [8, 64], strides = [1, 1]} : vector<8x448xf32> to vector<8x64xf32>
    %372 = vector.broadcast %242 : vector<1x64xf32> to vector<8x64xf32>
    %373 = arith.addf %371, %372 : vector<8x64xf32>
    %cst_94 = arith.constant dense<0.000000e+00> : vector<8xf32>
    %374 = vector.multi_reduction <add>, %373, %cst_94 [1] : vector<8x64xf32> to vector<8xf32>
    %375 = vector.shape_cast %374 : vector<8xf32> to vector<8x1xf32>
    %cst_95 = arith.constant 6.400000e+01 : f32
    %376 = vector.broadcast %cst_95 : f32 to vector<8x1xf32>
    %377 = arith.divf %375, %376 : vector<8x1xf32>
    %378 = vector.broadcast %377 : vector<8x1xf32> to vector<8x64xf32>
    %379 = arith.subf %373, %378 : vector<8x64xf32>
    %380 = arith.mulf %379, %379 : vector<8x64xf32>
    %cst_96 = arith.constant dense<0.000000e+00> : vector<8xf32>
    %381 = vector.multi_reduction <add>, %380, %cst_96 [1] : vector<8x64xf32> to vector<8xf32>
    %382 = vector.shape_cast %381 : vector<8xf32> to vector<8x1xf32>
    %cst_97 = arith.constant 6.400000e+01 : f32
    %383 = vector.broadcast %cst_97 : f32 to vector<8x1xf32>
    %384 = arith.divf %382, %383 : vector<8x1xf32>
    %385 = vector.broadcast %377 : vector<8x1xf32> to vector<8x64xf32>
    %386 = arith.subf %373, %385 : vector<8x64xf32>
    %cst_98 = arith.constant 9.99999974E-6 : f32
    %387 = vector.broadcast %cst_98 : f32 to vector<8x1xf32>
    %388 = arith.addf %384, %387 : vector<8x1xf32>
    %389 = math.rsqrt %388 : vector<8x1xf32>
    %390 = vector.broadcast %389 : vector<8x1xf32> to vector<8x64xf32>
    %391 = arith.mulf %386, %390 : vector<8x64xf32>
    %392 = vector.broadcast %243 : vector<1x64xf32> to vector<8x64xf32>
    %393 = arith.mulf %391, %392 : vector<8x64xf32>
    %394 = vector.broadcast %244 : vector<1x64xf32> to vector<8x64xf32>
    %395 = arith.addf %393, %394 : vector<8x64xf32>
    %cst_99 = arith.constant 0.000000e+00 : f32
    %396 = vector.broadcast %cst_99 : f32 to vector<8x64xf32>
    %397 = arith.maximumf %395, %396 : vector<8x64xf32>
    %398 = vector.broadcast %245 : vector<1x64xf32> to vector<8x64xf32>
    %399 = arith.mulf %397, %398 : vector<8x64xf32>
    %cst_100 = arith.constant dense<0.000000e+00> : vector<8xf32>
    %400 = vector.multi_reduction <add>, %399, %cst_100 [1] : vector<8x64xf32> to vector<8xf32>
    %401 = vector.shape_cast %400 : vector<8xf32> to vector<8x1xf32>
    %402 = vector.extract_strided_slice %241 {offsets = [0, 320], sizes = [8, 64], strides = [1, 1]} : vector<8x448xf32> to vector<8x64xf32>
    %403 = vector.broadcast %242 : vector<1x64xf32> to vector<8x64xf32>
    %404 = arith.addf %402, %403 : vector<8x64xf32>
    %cst_101 = arith.constant dense<0.000000e+00> : vector<8xf32>
    %405 = vector.multi_reduction <add>, %404, %cst_101 [1] : vector<8x64xf32> to vector<8xf32>
    %406 = vector.shape_cast %405 : vector<8xf32> to vector<8x1xf32>
    %cst_102 = arith.constant 6.400000e+01 : f32
    %407 = vector.broadcast %cst_102 : f32 to vector<8x1xf32>
    %408 = arith.divf %406, %407 : vector<8x1xf32>
    %409 = vector.broadcast %408 : vector<8x1xf32> to vector<8x64xf32>
    %410 = arith.subf %404, %409 : vector<8x64xf32>
    %411 = arith.mulf %410, %410 : vector<8x64xf32>
    %cst_103 = arith.constant dense<0.000000e+00> : vector<8xf32>
    %412 = vector.multi_reduction <add>, %411, %cst_103 [1] : vector<8x64xf32> to vector<8xf32>
    %413 = vector.shape_cast %412 : vector<8xf32> to vector<8x1xf32>
    %cst_104 = arith.constant 6.400000e+01 : f32
    %414 = vector.broadcast %cst_104 : f32 to vector<8x1xf32>
    %415 = arith.divf %413, %414 : vector<8x1xf32>
    %416 = vector.broadcast %408 : vector<8x1xf32> to vector<8x64xf32>
    %417 = arith.subf %404, %416 : vector<8x64xf32>
    %cst_105 = arith.constant 9.99999974E-6 : f32
    %418 = vector.broadcast %cst_105 : f32 to vector<8x1xf32>
    %419 = arith.addf %415, %418 : vector<8x1xf32>
    %420 = math.rsqrt %419 : vector<8x1xf32>
    %421 = vector.broadcast %420 : vector<8x1xf32> to vector<8x64xf32>
    %422 = arith.mulf %417, %421 : vector<8x64xf32>
    %423 = vector.broadcast %243 : vector<1x64xf32> to vector<8x64xf32>
    %424 = arith.mulf %422, %423 : vector<8x64xf32>
    %425 = vector.broadcast %244 : vector<1x64xf32> to vector<8x64xf32>
    %426 = arith.addf %424, %425 : vector<8x64xf32>
    %cst_106 = arith.constant 0.000000e+00 : f32
    %427 = vector.broadcast %cst_106 : f32 to vector<8x64xf32>
    %428 = arith.maximumf %426, %427 : vector<8x64xf32>
    %429 = vector.broadcast %245 : vector<1x64xf32> to vector<8x64xf32>
    %430 = arith.mulf %428, %429 : vector<8x64xf32>
    %cst_107 = arith.constant dense<0.000000e+00> : vector<8xf32>
    %431 = vector.multi_reduction <add>, %430, %cst_107 [1] : vector<8x64xf32> to vector<8xf32>
    %432 = vector.shape_cast %431 : vector<8xf32> to vector<8x1xf32>
    %433 = vector.extract_strided_slice %241 {offsets = [0, 384], sizes = [8, 64], strides = [1, 1]} : vector<8x448xf32> to vector<8x64xf32>
    %434 = vector.broadcast %242 : vector<1x64xf32> to vector<8x64xf32>
    %435 = arith.addf %433, %434 : vector<8x64xf32>
    %cst_108 = arith.constant dense<0.000000e+00> : vector<8xf32>
    %436 = vector.multi_reduction <add>, %435, %cst_108 [1] : vector<8x64xf32> to vector<8xf32>
    %437 = vector.shape_cast %436 : vector<8xf32> to vector<8x1xf32>
    %cst_109 = arith.constant 6.400000e+01 : f32
    %438 = vector.broadcast %cst_109 : f32 to vector<8x1xf32>
    %439 = arith.divf %437, %438 : vector<8x1xf32>
    %440 = vector.broadcast %439 : vector<8x1xf32> to vector<8x64xf32>
    %441 = arith.subf %435, %440 : vector<8x64xf32>
    %442 = arith.mulf %441, %441 : vector<8x64xf32>
    %cst_110 = arith.constant dense<0.000000e+00> : vector<8xf32>
    %443 = vector.multi_reduction <add>, %442, %cst_110 [1] : vector<8x64xf32> to vector<8xf32>
    %444 = vector.shape_cast %443 : vector<8xf32> to vector<8x1xf32>
    %cst_111 = arith.constant 6.400000e+01 : f32
    %445 = vector.broadcast %cst_111 : f32 to vector<8x1xf32>
    %446 = arith.divf %444, %445 : vector<8x1xf32>
    %447 = vector.broadcast %439 : vector<8x1xf32> to vector<8x64xf32>
    %448 = arith.subf %435, %447 : vector<8x64xf32>
    %cst_112 = arith.constant 9.99999974E-6 : f32
    %449 = vector.broadcast %cst_112 : f32 to vector<8x1xf32>
    %450 = arith.addf %446, %449 : vector<8x1xf32>
    %451 = math.rsqrt %450 : vector<8x1xf32>
    %452 = vector.broadcast %451 : vector<8x1xf32> to vector<8x64xf32>
    %453 = arith.mulf %448, %452 : vector<8x64xf32>
    %454 = vector.broadcast %243 : vector<1x64xf32> to vector<8x64xf32>
    %455 = arith.mulf %453, %454 : vector<8x64xf32>
    %456 = vector.broadcast %244 : vector<1x64xf32> to vector<8x64xf32>
    %457 = arith.addf %455, %456 : vector<8x64xf32>
    %cst_113 = arith.constant 0.000000e+00 : f32
    %458 = vector.broadcast %cst_113 : f32 to vector<8x64xf32>
    %459 = arith.maximumf %457, %458 : vector<8x64xf32>
    %460 = vector.broadcast %245 : vector<1x64xf32> to vector<8x64xf32>
    %461 = arith.mulf %459, %460 : vector<8x64xf32>
    %cst_114 = arith.constant dense<0.000000e+00> : vector<8xf32>
    %462 = vector.multi_reduction <add>, %461, %cst_114 [1] : vector<8x64xf32> to vector<8xf32>
    %463 = vector.shape_cast %462 : vector<8xf32> to vector<8x1xf32>
    %464 = tpu.concatenate %277, %308, %339, %370, %401, %432, %463 in 1 : vector<8x1xf32>, vector<8x1xf32>, vector<8x1xf32>, vector<8x1xf32>, vector<8x1xf32>, vector<8x1xf32>, vector<8x1xf32> -> vector<8x7xf32>
    %465 = vector.broadcast %246 : vector<1x1xf32> to vector<8x7xf32>
    %466 = arith.addf %464, %465 : vector<8x7xf32>
    %cst_115 = arith.constant 5.000000e-01 : f32
    %467 = vector.broadcast %cst_115 : f32 to vector<8x7xf32>
    %468 = arith.mulf %467, %466 : vector<8x7xf32>
    %469 = math.tanh %468 : vector<8x7xf32>
    %cst_116 = arith.constant 1.000000e+00 : f32
    %470 = vector.broadcast %cst_116 : f32 to vector<8x7xf32>
    %471 = arith.addf %469, %470 : vector<8x7xf32>
    %cst_117 = arith.constant 5.000000e-01 : f32
    %472 = vector.broadcast %cst_117 : f32 to vector<8x7xf32>
    %473 = arith.mulf %472, %471 : vector<8x7xf32>
    %cst_118 = arith.constant dense<0xFF800000> : vector<8xf32>
    %474 = vector.multi_reduction <maximumf>, %473, %cst_118 [1] : vector<8x7xf32> to vector<8xf32>
    %475 = vector.shape_cast %474 : vector<8xf32> to vector<8x1xf32>
    %476 = vector.broadcast %475 : vector<8x1xf32> to vector<8x7xf32>
    %477 = arith.subf %473, %476 : vector<8x7xf32>
    %478 = math.exp %477 : vector<8x7xf32>
    %cst_119 = arith.constant dense<0.000000e+00> : vector<8xf32>
    %479 = vector.multi_reduction <add>, %478, %cst_119 [1] : vector<8x7xf32> to vector<8xf32>
    %480 = vector.shape_cast %479 : vector<8xf32> to vector<8x1xf32>
    %481 = vector.broadcast %480 : vector<8x1xf32> to vector<8x7xf32>
    %482 = arith.divf %478, %481 : vector<8x7xf32>
    %483 = arith.mulf %238, %482 : vector<8x7xf32>
    %484 = arith.truncf %483 : vector<8x7xf32> to vector<8x7xbf16>
    %c0_120 = arith.constant 0 : index
    %c0_121 = arith.constant 0 : index
    %485 = vector.load %arg9[%c0_120, %c0_121] : memref<7x224xbf16, #tpu.memory_space<vmem>>, vector<7x224xbf16>
    %cst_122 = arith.constant dense<0.000000e+00> : vector<8x224xf32>
    %486 = tpu.matmul %484, %485, %cst_122 {dimension_numbers = #tpu.dot_dimension_numbers<[1], [0], [0], [1], [0, 0, 1, 1], [], []>} : vector<8x7xbf16>, vector<7x224xbf16>, vector<8x224xf32> -> vector<8x224xf32>
    %487 = arith.mulf %237, %486 : vector<8x224xf32>
    %488 = arith.truncf %487 : vector<8x224xf32> to vector<8x224xbf16>
    %c0_123 = arith.constant 0 : index
    %c0_124 = arith.constant 0 : index
    %489 = vector.load %arg10[%c0_123, %c0_124] : memref<224x64xbf16, #tpu.memory_space<vmem>>, vector<224x64xbf16>
    %cst_125 = arith.constant dense<0.000000e+00> : vector<8x64xf32>
    %490 = tpu.matmul %488, %489, %cst_125 {dimension_numbers = #tpu.dot_dimension_numbers<[1], [0], [0], [1], [0, 0, 1, 1], [], []>} : vector<8x224xbf16>, vector<224x64xbf16>, vector<8x64xf32> -> vector<8x64xf32>
    %491 = vector.extract_strided_slice %0 {offsets = [16, 0], sizes = [1, 64], strides = [1, 1]} : vector<24x128xf32> to vector<1x64xf32>
    %492 = vector.broadcast %491 : vector<1x64xf32> to vector<8x64xf32>
    %493 = arith.addf %490, %492 : vector<8x64xf32>
    %494 = vector.extract_strided_slice %0 {offsets = [17, 0], sizes = [1, 64], strides = [1, 1]} : vector<24x128xf32> to vector<1x64xf32>
    %495 = vector.extract_strided_slice %0 {offsets = [18, 0], sizes = [1, 64], strides = [1, 1]} : vector<24x128xf32> to vector<1x64xf32>
    %cst_126 = arith.constant dense<0.000000e+00> : vector<8xf32>
    %496 = vector.multi_reduction <add>, %493, %cst_126 [1] : vector<8x64xf32> to vector<8xf32>
    %497 = vector.shape_cast %496 : vector<8xf32> to vector<8x1xf32>
    %cst_127 = arith.constant 6.400000e+01 : f32
    %498 = vector.broadcast %cst_127 : f32 to vector<8x1xf32>
    %499 = arith.divf %497, %498 : vector<8x1xf32>
    %500 = vector.broadcast %499 : vector<8x1xf32> to vector<8x64xf32>
    %501 = arith.subf %493, %500 : vector<8x64xf32>
    %502 = arith.mulf %501, %501 : vector<8x64xf32>
    %cst_128 = arith.constant dense<0.000000e+00> : vector<8xf32>
    %503 = vector.multi_reduction <add>, %502, %cst_128 [1] : vector<8x64xf32> to vector<8xf32>
    %504 = vector.shape_cast %503 : vector<8xf32> to vector<8x1xf32>
    %cst_129 = arith.constant 6.400000e+01 : f32
    %505 = vector.broadcast %cst_129 : f32 to vector<8x1xf32>
    %506 = arith.divf %504, %505 : vector<8x1xf32>
    %507 = vector.broadcast %499 : vector<8x1xf32> to vector<8x64xf32>
    %508 = arith.subf %493, %507 : vector<8x64xf32>
    %cst_130 = arith.constant 9.99999974E-6 : f32
    %509 = vector.broadcast %cst_130 : f32 to vector<8x1xf32>
    %510 = arith.addf %506, %509 : vector<8x1xf32>
    %511 = math.rsqrt %510 : vector<8x1xf32>
    %512 = vector.broadcast %511 : vector<8x1xf32> to vector<8x64xf32>
    %513 = arith.mulf %508, %512 : vector<8x64xf32>
    %514 = vector.broadcast %494 : vector<1x64xf32> to vector<8x64xf32>
    %515 = arith.mulf %513, %514 : vector<8x64xf32>
    %516 = vector.broadcast %495 : vector<1x64xf32> to vector<8x64xf32>
    %517 = arith.addf %515, %516 : vector<8x64xf32>
    %cst_131 = arith.constant 0.000000e+00 : f32
    %518 = vector.broadcast %cst_131 : f32 to vector<8x64xf32>
    %519 = arith.maximumf %517, %518 : vector<8x64xf32>
    %520 = arith.truncf %519 : vector<8x64xf32> to vector<8x64xbf16>
    %c0_132 = arith.constant 0 : index
    %c0_133 = arith.constant 0 : index
    %521 = vector.load %arg11[%c0_132, %c0_133] : memref<64x32xbf16, #tpu.memory_space<vmem>>, vector<64x32xbf16>
    %cst_134 = arith.constant dense<0.000000e+00> : vector<8x32xf32>
    %522 = tpu.matmul %520, %521, %cst_134 {dimension_numbers = #tpu.dot_dimension_numbers<[1], [0], [0], [1], [0, 0, 1, 1], [], []>} : vector<8x64xbf16>, vector<64x32xbf16>, vector<8x32xf32> -> vector<8x32xf32>
    %523 = vector.extract_strided_slice %0 {offsets = [19, 0], sizes = [1, 32], strides = [1, 1]} : vector<24x128xf32> to vector<1x32xf32>
    %524 = vector.broadcast %523 : vector<1x32xf32> to vector<8x32xf32>
    %525 = arith.addf %522, %524 : vector<8x32xf32>
    %526 = vector.extract_strided_slice %0 {offsets = [20, 0], sizes = [1, 32], strides = [1, 1]} : vector<24x128xf32> to vector<1x32xf32>
    %527 = vector.extract_strided_slice %0 {offsets = [21, 0], sizes = [1, 32], strides = [1, 1]} : vector<24x128xf32> to vector<1x32xf32>
    %cst_135 = arith.constant dense<0.000000e+00> : vector<8xf32>
    %528 = vector.multi_reduction <add>, %525, %cst_135 [1] : vector<8x32xf32> to vector<8xf32>
    %529 = vector.shape_cast %528 : vector<8xf32> to vector<8x1xf32>
    %cst_136 = arith.constant 3.200000e+01 : f32
    %530 = vector.broadcast %cst_136 : f32 to vector<8x1xf32>
    %531 = arith.divf %529, %530 : vector<8x1xf32>
    %532 = vector.broadcast %531 : vector<8x1xf32> to vector<8x32xf32>
    %533 = arith.subf %525, %532 : vector<8x32xf32>
    %534 = arith.mulf %533, %533 : vector<8x32xf32>
    %cst_137 = arith.constant dense<0.000000e+00> : vector<8xf32>
    %535 = vector.multi_reduction <add>, %534, %cst_137 [1] : vector<8x32xf32> to vector<8xf32>
    %536 = vector.shape_cast %535 : vector<8xf32> to vector<8x1xf32>
    %cst_138 = arith.constant 3.200000e+01 : f32
    %537 = vector.broadcast %cst_138 : f32 to vector<8x1xf32>
    %538 = arith.divf %536, %537 : vector<8x1xf32>
    %539 = vector.broadcast %531 : vector<8x1xf32> to vector<8x32xf32>
    %540 = arith.subf %525, %539 : vector<8x32xf32>
    %cst_139 = arith.constant 9.99999974E-6 : f32
    %541 = vector.broadcast %cst_139 : f32 to vector<8x1xf32>
    %542 = arith.addf %538, %541 : vector<8x1xf32>
    %543 = math.rsqrt %542 : vector<8x1xf32>
    %544 = vector.broadcast %543 : vector<8x1xf32> to vector<8x32xf32>
    %545 = arith.mulf %540, %544 : vector<8x32xf32>
    %546 = vector.broadcast %526 : vector<1x32xf32> to vector<8x32xf32>
    %547 = arith.mulf %545, %546 : vector<8x32xf32>
    %548 = vector.broadcast %527 : vector<1x32xf32> to vector<8x32xf32>
    %549 = arith.addf %547, %548 : vector<8x32xf32>
    %550 = math.tanh %549 : vector<8x32xf32>
    %551 = arith.cmpf one, %550, %550 : vector<8x32xf32>
    %cst_140 = arith.constant 0.000000e+00 : f32
    %552 = vector.broadcast %cst_140 : f32 to vector<8x32xf32>
    %553 = arith.select %551, %552, %550 : vector<8x32xi1>, vector<8x32xf32>
    %cst_141 = arith.constant -5.000000e+00 : f32
    %cst_142 = arith.constant 5.000000e+00 : f32
    %554 = vector.broadcast %cst_141 : f32 to vector<8x32xf32>
    %555 = arith.maximumf %554, %553 : vector<8x32xf32>
    %556 = vector.broadcast %cst_142 : f32 to vector<8x32xf32>
    %557 = arith.minimumf %556, %555 : vector<8x32xf32>
    %c0_143 = arith.constant 0 : index
    %c0_144 = arith.constant 0 : index
    %558 = vector.load %arg12[%c0_143, %c0_144] : memref<8x32xf32, #tpu.memory_space<vmem>>, vector<8x32xf32>
    tpu.vector_store %arg12[%c0_143, %c0_144], %557 {strides = array<i32>} : memref<8x32xf32, #tpu.memory_space<vmem>>, vector<8x32xf32>,
    return
  }
  func.func @transform_0(%arg0: i32) -> (i32, i32, i32) {
    %c0_i32 = arith.constant 0 : i32
    %c0_i32_0 = arith.constant 0 : i32
    %c0_i32_1 = arith.constant 0 : i32
    return %c0_i32, %arg0, %c0_i32_0 : i32, i32, i32
  }
  func.func @transform_1(%arg0: i32) -> (i32, i32) {
    %c0_i32 = arith.constant 0 : i32
    %c0_i32_0 = arith.constant 0 : i32
    return %arg0, %c0_i32 : i32, i32
  }
  func.func @transform_2(%arg0: i32) -> (i32, i32) {
    %c0_i32 = arith.constant 0 : i32
    %c0_i32_0 = arith.constant 0 : i32
    return %arg0, %c0_i32 : i32, i32
  }
  func.func @transform_3(%arg0: i32) -> (i32, i32, i32) {
    %c0_i32 = arith.constant 0 : i32
    %c0_i32_0 = arith.constant 0 : i32
    %c0_i32_1 = arith.constant 0 : i32
    %c0_i32_2 = arith.constant 0 : i32
    return %c0_i32, %c0_i32_0, %c0_i32_1 : i32, i32, i32
  }
  func.func @transform_4(%arg0: i32) -> (i32, i32, i32) {
    %c0_i32 = arith.constant 0 : i32
    %c0_i32_0 = arith.constant 0 : i32
    %c0_i32_1 = arith.constant 0 : i32
    %c0_i32_2 = arith.constant 0 : i32
    return %c0_i32, %c0_i32_0, %c0_i32_1 : i32, i32, i32
  }
  func.func @transform_5(%arg0: i32) -> (i32, i32) {
    %c0_i32 = arith.constant 0 : i32
    %c0_i32_0 = arith.constant 0 : i32
    %c0_i32_1 = arith.constant 0 : i32
    return %c0_i32, %c0_i32_0 : i32, i32
  }
  func.func @transform_6(%arg0: i32) -> (i32, i32) {
    %c0_i32 = arith.constant 0 : i32
    %c0_i32_0 = arith.constant 0 : i32
    %c0_i32_1 = arith.constant 0 : i32
    return %c0_i32, %c0_i32_0 : i32, i32
  }
  func.func @transform_7(%arg0: i32) -> (i32, i32) {
    %c0_i32 = arith.constant 0 : i32
    %c0_i32_0 = arith.constant 0 : i32
    %c0_i32_1 = arith.constant 0 : i32
    return %c0_i32, %c0_i32_0 : i32, i32
  }
  func.func @transform_8(%arg0: i32) -> (i32, i32) {
    %c0_i32 = arith.constant 0 : i32
    %c0_i32_0 = arith.constant 0 : i32
    %c0_i32_1 = arith.constant 0 : i32
    return %c0_i32, %c0_i32_0 : i32, i32
  }
  func.func @transform_9(%arg0: i32) -> (i32, i32) {
    %c0_i32 = arith.constant 0 : i32
    %c0_i32_0 = arith.constant 0 : i32
    %c0_i32_1 = arith.constant 0 : i32
    return %c0_i32, %c0_i32_0 : i32, i32
  }
  func.func @transform_10(%arg0: i32) -> (i32, i32) {
    %c0_i32 = arith.constant 0 : i32
    %c0_i32_0 = arith.constant 0 : i32
    %c0_i32_1 = arith.constant 0 : i32
    return %c0_i32, %c0_i32_0 : i32, i32
  }
  func.func @transform_11(%arg0: i32) -> (i32, i32) {
    %c0_i32 = arith.constant 0 : i32
    %c0_i32_0 = arith.constant 0 : i32
    return %arg0, %c0_i32 : i32, i32
  }
}

</mosaic_0001>

<bundles_post_ra>
// kernel: enhanced_feature_encoder.1
= control target key start
LH: loop header
LB: loop body
LE: loop exit
PB: predicated region body
PF: predicated region fallthrough
CT: control target
= control target key end

     0   :  { %s3327_s0 = inlined_call_operand.vmem [shape: f32[5,16,32], index: 0, kind: input, shape index: {}]   ;;  %s3328_s1 = inlined_call_operand.vmem [shape: f32[16,16], index: 1, kind: input, shape index: {}]   ;;  %s3329_s2 = inlined_call_operand.vmem [shape: f32[16,16], index: 2, kind: input, shape index: {}]   ;;  %s3330_s3 = inlined_call_operand.vmem [shape: f32[5,1,32], index: 3, kind: input, shape index: {}]   ;;  %s3331_s4 = inlined_call_operand.vmem [shape: f32[5,1,32], index: 4, kind: input, shape index: {}]   ;;  %s3332_s5 = inlined_call_operand.vmem [shape: f32[24,128], index: 5, kind: input, shape index: {}]   ;;  %s3333_s6 = inlined_call_operand.vmem [shape: bf16[64,96], index: 6, kind: input, shape index: {}]   ;;  %s3334_s7 = inlined_call_operand.vmem [shape: bf16[224,448], index: 7, kind: input, shape index: {}]   ;;  %s3335_s8 = inlined_call_operand.vmem [shape: bf16[7,224], index: 8, kind: input, shape index: {}]   ;;  %s3336_s9 = inlined_call_operand.vmem [shape: bf16[224,64], index: 9, kind: input, shape index: {}]   ;;  %s3337_s10 = inlined_call_operand.vmem [shape: bf16[64,32], index: 10, kind: input, shape index: {}]   ;;  %s3338_s11 = inlined_call_operand.hbm [shape: f32[16,32], index: 11, kind: output, shape index: {}]  }
   0x1   :  { %3342 = sst [smem:[#allocation6_spill]] %s3327_s0 }
   0x2   :  { %16 = vsyncpa [#allocation4], 0 }
   0x3   :  { %18 = vsyncpa [#allocation4 + $0x1], 0  ;;  %s2587_s17 = smov 0   ;;  %s2589_s18 = smov 0  }
   0x4   :  { %s2591_s19 = smov 0   ;;  %s2593_s20 = smov 0  }
   0x5 LB: > { %s2608_s21 = sadd.s32 4294967295, %s2516_s20   ;;  %s2092_s22 = sadd.s32 4294967294, %s2516_s20   ;;  %s2516_s20 = sphi %s2593_s20, %s3351_s20   ;;  %s2512_s19 = sphi %s2591_s19, %s3350_s19   ;;  %s2508_s18 = sphi %s2589_s18, %s3349_s18   ;;  %s2504_s17 = sphi %s2587_s17, %s3348_s17  }
   0x6   : > { %s2612_s23 = sadd.s32 1, %s2516_s20   ;;  %s31_s24 = sadd.s32 1, %s2512_s19 }
   0x7   : > { %s28_s25 = ssub.s32 %s2516_s20, %s2612_s23  ;;  %p38_p0 = scmp.ne.s32.totalorder %s2512_s19, %s2508_s18 }
   0x8   : > { %p29_p1 = scmp.eq.s32.totalorder %s28_s25, 0  ;;  %p39_p2 = scmp.eq.s32.totalorder %s2516_s20, 0 }
   0x9   : > { %p288_p3 = scmp.eq.s32.totalorder %s2608_s21, 1  ;;  %p293_p4 = scmp.ne.s32.totalorder %s2508_s18, %s2504_s17 }
   0xa   : > { %s2624_s26 = scalar_select %p29_p1, %s2512_s19, %s31_s24  }
   0xb   : > { %p40_p5 = por %p39_p2, %p38_p0  ;;  %p2626_p6 = por %p288_p3, %p38_p0 }
   0xc   : > { %p294_p7 = scmp.eq.s32.totalorder %s2092_s22, 1  ;;  %p2094_p9 = scmp.ge.s32.totalorder %s2516_s20, 2 }
   0xe   : > { %p2630_p8 = por %p294_p7, %p293_p4  ;;  %334 = sbr.rel (%p2094_p9) target bundleno = 34 (0x22), region = 48 }
  0x15   : > { %337 = sbr.rel (!%p40_p5) target bundleno = 34 (0x22), region = 52  ;;  %s339_s29 = sand.u32 (%p40_p5), 1, %s2512_s19  }
  0x16   : > { %s2095_s30 = sshll.u32 (%p40_p5), %s2516_s20, 3  ;;  %s2235_s12 = smul.u32 (%p40_p5), 40, %s339_s29 }
  0x17   : > { %s3345_s0 = sld [smem:[#allocation6_spill]] (%p40_p5) }
  0x18   : > { %s341_s16 = scalar_lea.vmem (%p40_p5), [#allocation2], %s2235_s12 }
  0x1d   : > { %s343_s15 = scalar_lea.vmem %s3345_s0, %s2095_s30 }
  0x1e   : > { %v379_v0 = vld [vmem:[%s343_s15] sm:$0xff]  ;;  %v381_v1 = vld [vmem:[%s343_s15 + $0x10] sm:$0xff] }
  0x1f   : > { %v383_v2 = vld [vmem:[%s343_s15 + $0x20] sm:$0xff]  ;;  %v385_v3 = vld [vmem:[%s343_s15 + $0x30] sm:$0xff]  ;;  %380 = vst [vmem:[%s341_s16] sm:$0xff] %v379_v0  ;;  %382 = vst [vmem:[%s341_s16 + $0x8] sm:$0xff] %v381_v1 }
  0x20   : > { %v387_v4 = vld [vmem:[%s343_s15 + $0x40] sm:$0xff]  ;;  %384 = vst [vmem:[%s341_s16 + $0x10] sm:$0xff] %v383_v2  ;;  %386 = vst [vmem:[%s341_s16 + $0x18] sm:$0xff] %v385_v3 }
  0x21   : > { %388 = vst [vmem:[%s341_s16 + $0x20] sm:$0xff] %v387_v4 }
  0x22 PF: > { %p2096_p10 = scmp.ge.s32.totalorder %s2516_s20, 1  ;;  %p407_p11 = scmp.lt.s32.totalorder %s2516_s20, 3 }
  0x24   : > { %p408_p12 = pnand %p2096_p10, %p407_p11 }
  0x25   : > { %p461_p13 = scmp.lt.s32.totalorder (!%p408_p12), %s2608_s21, 1  ;;  %s2646_s22 = sand.u32 (!%p408_p12), 1, %s2508_s18   ;;  %vm488_vm0 = vcmask (!%p408_p12), 261120   ;;  %vm626_vm1 = vcmask (!%p408_p12), 130048   ;;  %v2286_v26 = vld [vmem:[%s3333_s6] sm:$0xff] (!%p408_p12)   ;;  %v2518_v27 = vmov (!%p408_p12), 0.0   ;;  %v641_v31 = vlaneseq (!%p408_p12) }
  0x26   : > { %411 = sbr.rel (%p408_p12) target bundleno = 4236 (0x108c), region = 98  ;;  %2211 = vmatprep.subr.bf16.mxu0 (!%p408_p12), %v2518_v27  ;;  %v2287_v28 = vld [vmem:[%s3333_s6 + $0x8] sm:$0xff] (!%p408_p12)   ;;  %v2288_v37 = vld [vmem:[%s3333_s6 + $0x10] sm:$0xff] (!%p408_p12)   ;;  %v2689_v39 = vld [vmem:[%s3332_s5] sm:$0xff] (!%p408_p12)  ;;  %vm2519_vm2 = vmmov (!%p408_p12), 0   ;;  %vm684_vm3 = vcmask (!%p408_p12), 392192  }
  0x27   : > { %s2236_s24 = smul.u32 (!%p408_p12), 40, %s2646_s22  ;;  %2212 = vmatpush3.bf16.msra.mxu0 (!%p408_p12), %v2286_v26  ;;  %v2678_v35 = vshrl.u32 (!%p408_p12), %v641_v31, 7  ;;  %v2289_v41 = vld [vmem:[%s3333_s6 + $0x18] sm:$0xff] (!%p408_p12)   ;;  %2219 = vmatprep.mubr.msk.bf16.mxu0 (!%p408_p12), %vm2519_vm2, %v2518_v27  ;;  %v2103_v61 = vld [vmem:[%s3330_s3 + $0x3] ss:$0 sm:$0xff] (!%p408_p12)  ;;  %vm723_vm4 = vcmask (!%p408_p12), 523264  }
  0x28   : > { %2213 = vmatprep.subr.bf16.mxu0 (!%p408_p12), %v2518_v27  ;;  %v2108_v63 = vld [vmem:[%s3331_s4 + $0x3] ss:$0 sm:$0xff] (!%p408_p12)  ;;  %s3339_s15 = smov (!%p408_p12), 96   ;;  %s3340_s16 = smov (!%p408_p12), 64   ;;  %vm952_vm5 = vcmask (!%p408_p12), 7168   ;;  %vm954_vm6 = vcmask (!%p408_p12), 15360  }
  0x29   : > { %s2650_s30 = scalar_lea.vmem (!%p408_p12), [#allocation2], %s2236_s24  ;;  %v2684_v38 = vsub.s32 (!%p408_p12), 0, %v2678_v35  ;;  %v2693_v40 = vsub.s32 (!%p408_p12), 1, %v2678_v35  ;;  %v2701_v43 = vsub.s32 (!%p408_p12), 2, %v2678_v35  ;;  %v2708_v47 = vsub.s32 (!%p408_p12), 3, %v2678_v35  ;;  %s2520_s24 = smov (!%p408_p12), 32  }
  0x2a   : > { %v476_v5 = vld [vmem:[%s2650_s30 + $0x18] sm:$0xff] (!%p408_p12)  ;;  %s3346_s12 = smov (!%p408_p12), 64   ;;  %s3347_s13 = smov (!%p408_p12), 96   ;;  %vm956_vm7 = vcmask (!%p408_p12), 23552   ;;  %vm958_vm8 = vcmask (!%p408_p12), 31744   ;;  %vm960_vm9 = vcmask (!%p408_p12), 39936  }
  0x2b   : > { %v498_v6 = vsel (!%p408_p12), %vm488_vm0, %v476_v5, 0.0  ;;  %2214 = vmatpush3.bf16.msra.mxu0 (!%p408_p12), %v2287_v28  ;;  %v644_v42 = vrot.slane (!%p408_p12), %v2689_v39, %v2684_v38  ;;  %v649_v46 = vrot.slane (!%p408_p12), %v2689_v39, %v2693_v40  ;;  %v668_v49 = vrot.slane (!%p408_p12), %v2689_v39, %v2701_v43 }
  0x2c   : > { %499 = vadd.xlane.f32.xlu1 (!%p408_p12), %v498_v6  ;;  %2215 = vmatprep.subr.bf16.mxu0 (!%p408_p12), %v2518_v27  ;;  %v673_v53 = vrot.slane (!%p408_p12), %v2689_v39, %v2708_v47  ;;  %v2725_v6 = vsub.s32 (!%p408_p12), 4, %v2678_v35  ;;  %vm962_vm10 = vcmask (!%p408_p12), 48128   ;;  %vm948_vm11 = vcmask (!%p408_p12), 785408  }
  0x2d   : > { %s462_s25 = scalar_select %p461_p13, %s2608_s21, 1  ;;  %vm1619_vm12 = vcmask 56320   ;;  %vm1642_vm13 = vcmask 1042432   ;;  %vm1643_vm14 = vcmask 1043456  }
  0x2f   : > { %s2098_s29 = sshll.u32 %s462_s25, 3  ;;  %2216 = vmatpush3.bf16.msra.mxu0 %v2288_v37  ;;  %s2521_s25 = smov 48  }
  0x30   : > { %s464_s14 = scalar_lea.vmem %s3328_s1, %s2098_s29  ;;  %s468_s0 = scalar_lea.vmem %s3329_s2, %s2098_s29  ;;  %2217 = vmatprep.subr.bf16.mxu0 %v2518_v27 }
  0x31   : > { %v625_v7 = vld [vmem:[%s464_s14] sm:$0xff] }
  0x32   : > { %v651_v8 = vld [vmem:[%s468_s0] sm:$0xff]  ;;  %v627_v9 = vsel %vm626_vm1, %v625_v7, 0.0 }
  0x33   : > { %628 = vadd.xlane.f32.xlu0 %v627_v9  ;;  %v652_v10 = vsel %vm626_vm1, %v651_v8, 0.0  ;;  %2218 = vmatpush3.bf16.msra.mxu0 %v2289_v41 }
  0x37   : > { %653 = vadd.xlane.f32.xlu0 %v652_v10 }
  0xb9   : > { %v500_v11 = vpop.xlane.xlu1 %499 }
  0xba   : > { %v508_v12 = vmul.f32 0.03125, %v500_v11 }
  0xbc   : > { %v2662_v15 = vsub.f32 %v476_v5, %v508_v12 }
  0xbe   : > { %v518_v20 = vmul.f32 %v2662_v15, %v2662_v15 }
  0xc0   : > { %v629_v13 = vpop.xlane.xlu0 %628  ;;  %v529_v24 = vsel %vm488_vm0, %v518_v20, 0.0 }
  0xc1   : > { %v631_v14 = vmul.f32 0.0625, %v629_v13 }
  0xc3   : > { %v632_v16 = vsub.f32 %v625_v7, %v631_v14  ;;  %v698_v7 = vrot.slane %v2689_v39, %v2725_v6  ;;  %v474_v14 = vld [vmem:[%s2650_s30 + $0x8] sm:$0xff] }
  0xc4   : > { %v654_v17 = vpop.xlane.xlu0 %653 }
  0xc5   : > { %v655_v18 = vmul.f32 0.0625, %v654_v17  ;;  %v633_v19 = vmul.f32 %v632_v16, %v632_v16 }
  0xc7   : > { %v656_v21 = vsub.f32 %v651_v8, %v655_v18  ;;  %v634_v22 = vsel %vm626_vm1, %v633_v19, 0.0  ;;  %v475_v18 = vld [vmem:[%s2650_s30 + $0x10] sm:$0xff] }
  0xc8   : > { %635 = vadd.xlane.f32.xlu1 %v634_v22  ;;  %v495_v20 = vsel %vm488_vm0, %v475_v18, 0.0 }
  0xc9   : > { %v657_v23 = vmul.f32 %v656_v21, %v656_v21 }
  0xcb   : > { %v658_v25 = vsel %vm626_vm1, %v657_v23, 0.0 }
  0xcc   : > { %659 = vadd.xlane.f32.xlu0 %v658_v25  ;;  %530 = vadd.xlane.f32.xlu1 %v529_v24 }
 0x155   : > { %v636_v29 = vpop.xlane.xlu1 %635 }
 0x156   : > { %v637_v30 = vmul.f32 0.0625, %v636_v29 }
 0x158   : > { %v638_v32 = vadd.f32 1e-05, %v637_v30 }
 0x159   : > { %v660_v33 = vpop.xlane.xlu0 %659  ;;  %v531_v56 = vpop.xlane.xlu1 %530 }
 0x15a   : > { %2394 = vrsqrt.f32 %v638_v32  ;;  %v661_v34 = vmul.f32 0.0625, %v660_v33  ;;  %v538_v57 = vmul.f32 0.03125, %v531_v56 }
 0x15c   : > { %v662_v36 = vadd.f32 1e-05, %v661_v34  ;;  %v543_v58 = vadd.f32 1e-05, %v538_v57 }
 0x15e   : > { %2396 = vrsqrt.f32 %v662_v36 }
 0x15f   : > { %2398 = vrsqrt.f32 %v543_v58 }
 0x164   : > { %v2395_v44 = vpop.eup %2394 }
 0x165   : > { %v640_v45 = vmul.f32 %v2395_v44, %v632_v16  ;;  %v492_v16 = vsel %vm488_vm0, %v474_v14, 0.0  ;;  %v477_v44 = vld [vmem:[%s2650_s30 + $0x20] sm:$0xff] }
 0x167   : > { %v645_v48 = vmul.f32 %v644_v42, %v640_v45  ;;  %v473_v45 = vld [vmem:[%s2650_s30] sm:$0xff]  ;;  %s2097_s30 = sshll.u32 %s2646_s22, 3 }
 0x168   : > { %v2397_v50 = vpop.eup %2396  ;;  %s460_s0 = scalar_lea.vmem [#allocation3], %s2097_s30 }
 0x169   : > { %v650_v51 = vadd.f32 %v649_v46, %v645_v48  ;;  %v664_v52 = vmul.f32 %v2397_v50, %v656_v21  ;;  %v2399_v59 = vpop.eup %2398  ;;  %v501_v48 = vsel %vm488_vm0, %v477_v44, 0.0  ;;  %v489_v50 = vsel %vm488_vm0, %v473_v45, 0.0 }
 0x16a   : > { %v553_v60 = vmul.f32 %v2399_v59, %v2662_v15 }
 0x16b   : > { %676 = vrot.lane.b32.xlu0 %v650_v51, %s2520_s24  ;;  %v669_v54 = vmul.f32 %v668_v49, %v664_v52 }
 0x16c   : > { %v588_v62 = vmul.f32 %v2103_v61, %v553_v60  ;;  %v2768_v61 = vld [vmem:[%s3332_s5 + $0x8] sm:$0xff] }
 0x16d   : > { %v674_v55 = vadd.f32 %v673_v53, %v669_v54 }
 0x16e   : > { %v623_v1 = vadd.f32 %v2108_v63, %v588_v62  ;;  %v854_v62 = vrot.slane %v2768_v61, %v2693_v40  ;;  %v824_v63 = vrot.slane %v2768_v61, %v2684_v38 }
 0x16f   : > { %680 = vrot.lane.b32.xlu1 %v674_v55, %s2521_s25 }
 0x1dd   : > { %v677_v0 = vpop.permute.xlu0 %676 }
 0x1de   : > { %v683_v2 = vsel %vm488_vm0, %v623_v1, %v677_v0  ;;  %v814_v0 = vsub.s32 7, %v2678_v35  ;;  %v863_v1 = vrot.slane %v2768_v61, %v2701_v43 }
 0x1e1   : > { %v681_v3 = vpop.permute.xlu1 %680 }
 0x1e2   : > { %v685_v4 = vsel %vm684_vm3, %v683_v2, %v681_v3  ;;  %v815_v2 = vrot.slane %v2689_v39, %v814_v0 }
 0x1e3   : > { %v686_v5 = vpack.c.bf16 %v685_v4, %v685_v4 }
 0x1e5   : > { %2220 = vmatmul.mubr.msk.bf16.vlgmr.msra.gmra.mrb[0].mxu0 %vm723_vm4, %v686_v5 }
 0x2b8   : > { %v761_v8 = vpop.f32.mrb[0].mxu0 }
 0x2b9   : > { %v762_v9 = vadd.f32 %v761_v8, %v698_v7  ;;  %v2221_v10 = vpop.f32.mrb[1].mxu0 }
 0x2ba   : > { %v764_v11 = vpop.f32.mrb[2].mxu0 }
 0x2bb   : > { %792 = vrot.lane.b32.xlu1 %v762_v9, %s3339_s15  ;;  %v2222_v12 = vpop.f32.mrb[3].mxu0  ;;  %v767_v21 = vmax.f32 %v762_v9, 0.0 }
 0x2bd   : > { %v768_v22 = vsel %vm488_vm0, %v767_v21, 0.0 }
 0x2bf   : > { %831 = vrot.lane.b32.xlu1 %v762_v9, %s3340_s16 }
 0x32d   : > { %v793_v13 = vpop.permute.xlu1 %792 }
 0x32e   : > { %v795_v15 = vsel %vm488_vm0, %v793_v13, 0.0 }
 0x32f   : > { %796 = vadd.xlane.f32.xlu0 %v795_v15 }
 0x331   : > { %v832_v17 = vpop.permute.xlu1 %831 }
 0x332   : > { %v834_v19 = vsel %vm488_vm0, %v832_v17, 0.0 }
 0x333   : > { %835 = vadd.xlane.f32.xlu1 %v834_v19  ;;  %493 = vadd.xlane.f32.xlu0 %v492_v16 }
 0x337   : > { %496 = vadd.xlane.f32.xlu0 %v495_v20  ;;  %v2106_v20 = vld [vmem:[%s3331_s4 + $0x1] ss:$0 sm:$0xff] }
 0x33b   : > { %769 = vadd.xlane.f32.xlu0 %v768_v22 }
 0x3bc   : > { %v797_v23 = vpop.xlane.xlu0 %796 }
 0x3bd   : > { %v798_v24 = vmul.f32 0.03125, %v797_v23 }
 0x3bf   : > { %v2738_v25 = vsub.f32 %v762_v9, %v798_v24 }
 0x3c0   : > { %v836_v26 = vpop.xlane.xlu1 %835  ;;  %v494_v32 = vpop.xlane.xlu0 %493 }
 0x3c1   : > { %v837_v28 = vmul.f32 0.03125, %v836_v26  ;;  %v800_v29 = vmul.f32 %v2738_v25, %v2738_v25  ;;  %v506_v36 = vmul.f32 0.03125, %v494_v32 }
 0x3c3   : > { %v2742_v30 = vsub.f32 %v762_v9, %v837_v28  ;;  %802 = vrot.lane.b32.xlu1 %v800_v29, %s3339_s15  ;;  %v511_v42 = vsub.f32 %v474_v14, %v506_v36 }
 0x3c4   : > { %v497_v33 = vpop.xlane.xlu0 %496 }
 0x3c5   : > { %v839_v31 = vmul.f32 %v2742_v30, %v2742_v30  ;;  %v507_v34 = vmul.f32 0.03125, %v497_v33  ;;  %v516_v51 = vmul.f32 %v511_v42, %v511_v42 }
 0x3c7   : > { %841 = vrot.lane.b32.xlu0 %v839_v31, %s3340_s16  ;;  %v2748_v37 = vsub.f32 %v475_v18, %v507_v34  ;;  %v523_v54 = vsel %vm488_vm0, %v516_v51, 0.0  ;;  %v2101_v18 = vld [vmem:[%s3330_s3 + $0x1] ss:$0 sm:$0xff] }
 0x3c8   : > { %v770_v41 = vpop.xlane.xlu0 %769 }
 0x3c9   : > { %v771_v46 = vmul.f32 0.03125, %v770_v41  ;;  %v517_v49 = vmul.f32 %v2748_v37, %v2748_v37 }
 0x3cb   : > { %v2756_v52 = vsub.f32 %v767_v21, %v771_v46  ;;  %v526_v53 = vsel %vm488_vm0, %v517_v49, 0.0 }
 0x3cd   : > { %v773_v55 = vmul.f32 %v2756_v52, %v2756_v52 }
 0x3cf   : > { %v774_v56 = vsel %vm488_vm0, %v773_v55, 0.0 }
 0x3e6   : > { %502 = vadd.xlane.f32.xlu0 %v501_v48 }
 0x3e7   : > { %490 = vadd.xlane.f32.xlu1 %v489_v50 }
 0x3ea   : > { %527 = vadd.xlane.f32.xlu0 %v526_v53 }
 0x3eb   : > { %524 = vadd.xlane.f32.xlu1 %v523_v54 }
 0x3ef   : > { %775 = vadd.xlane.f32.xlu1 %v774_v56 }
 0x435   : > { %v803_v57 = vpop.permute.xlu1 %802 }
 0x436   : > { %v805_v58 = vsel %vm488_vm0, %v803_v57, 0.0 }
 0x437   : > { %806 = vadd.xlane.f32.xlu1 %v805_v58 }
 0x439   : > { %v842_v59 = vpop.permute.xlu0 %841 }
 0x43a   : > { %v844_v60 = vsel %vm488_vm0, %v842_v59, 0.0 }
 0x43b   : > { %845 = vadd.xlane.f32.xlu0 %v844_v60 }
 0x448   : > { %856 = vrot.lane.b32.xlu1 %v854_v62, %s3340_s16 }
 0x44c   : > { %826 = vrot.lane.b32.xlu1 %v824_v63, %s2520_s24 }
 0x450   : > { %865 = vrot.lane.b32.xlu1 %v863_v1, %s3340_s16  ;;  %v2102_v1 = vld [vmem:[%s3330_s3 + $0x2] ss:$0 sm:$0xff] }
 0x451   : > { %817 = vrot.lane.b32.xlu0 %v815_v2, %s2520_s24 }
 0x473   : > { %v503_v3 = vpop.xlane.xlu0 %502 }
 0x474   : > { %v509_v4 = vmul.f32 0.03125, %v503_v3  ;;  %v491_v5 = vpop.xlane.xlu1 %490  ;;  %v2107_v3 = vld [vmem:[%s3331_s4 + $0x2] ss:$0 sm:$0xff] }
 0x475   : > { %v505_v7 = vmul.f32 0.03125, %v491_v5 }
 0x476   : > { %v2782_v8 = vsub.f32 %v477_v44, %v509_v4  ;;  %v2823_v4 = vsub.s32 5, %v2678_v35 }
 0x477   : > { %v2784_v9 = vsub.f32 %v473_v45, %v505_v7  ;;  %v528_v28 = vpop.xlane.xlu0 %527 }
 0x478   : > { %v525_v10 = vpop.xlane.xlu1 %524  ;;  %v519_v11 = vmul.f32 %v2782_v8, %v2782_v8  ;;  %v537_v50 = vmul.f32 0.03125, %v528_v28 }
 0x479   : > { %v536_v12 = vmul.f32 0.03125, %v525_v10  ;;  %v515_v13 = vmul.f32 %v2784_v9, %v2784_v9 }
 0x47a   : > { %v532_v14 = vsel %vm488_vm0, %v519_v11, 0.0  ;;  %v542_v57 = vadd.f32 1e-05, %v537_v50  ;;  %v788_v11 = vsub.s32 6, %v2678_v35 }
 0x47b   : > { %v541_v15 = vadd.f32 1e-05, %v536_v12  ;;  %533 = vadd.xlane.f32.xlu1 %v532_v14  ;;  %v520_v16 = vsel %vm488_vm0, %v515_v13, 0.0 }
 0x47c   : > { %521 = vadd.xlane.f32.xlu0 %v520_v16  ;;  %v776_v26 = vpop.xlane.xlu1 %775  ;;  %v789_v14 = vrot.slane %v2689_v39, %v788_v11 }
 0x47d   : > { %2400 = vrsqrt.f32 %v541_v15 }
 0x487   : > { %v2401_v17 = vpop.eup %2400 }
 0x488   : > { %v551_v19 = vmul.f32 %v2401_v17, %v511_v42 }
 0x48a   : > { %v586_v21 = vmul.f32 %v2101_v18, %v551_v19 }
 0x48c   : > { %v2798_v22 = vadd.f32 %v2106_v20, %v586_v21 }
 0x48e   : > { %v878_v23 = vmul.f32 %v2798_v22, %v2798_v22 }
 0x490   : > { %v879_v24 = vsel %vm488_vm0, %v878_v23, 0.0 }
 0x491   : > { %880 = vadd.xlane.f32.xlu1 %v879_v24 }
 0x4c4   : > { %v807_v29 = vpop.xlane.xlu1 %806 }
 0x4c5   : > { %v808_v31 = vmul.f32 0.03125, %v807_v29  ;;  %v2100_v29 = vld [vmem:[%s3330_s3] ss:$0 sm:$0xff] }
 0x4c7   : > { %v809_v32 = vadd.f32 1e-05, %v808_v31 }
 0x4c8   : > { %v846_v33 = vpop.xlane.xlu0 %845  ;;  %v857_v41 = vpop.permute.xlu1 %856 }
 0x4c9   : > { %2402 = vrsqrt.f32 %v809_v32  ;;  %v847_v34 = vmul.f32 0.03125, %v846_v33  ;;  %v2105_v33 = vld [vmem:[%s3331_s4] ss:$0 sm:$0xff] }
 0x4cb   : > { %v848_v36 = vadd.f32 1e-05, %v847_v34  ;;  %v2109_v34 = vld [vmem:[%s3331_s4 + $0x4] ss:$0 sm:$0xff] }
 0x4cc   : > { %v818_v44 = vpop.permute.xlu0 %817  ;;  %v827_v45 = vpop.permute.xlu1 %826 }
 0x4cd   : > { %2404 = vrsqrt.f32 %v848_v36 }
 0x4ce   : > { %2406 = vrsqrt.f32 %v542_v57 }
 0x4d0   : > { %v866_v54 = vpop.permute.xlu1 %865 }
 0x4d3   : > { %v2403_v42 = vpop.eup %2402 }
 0x4d4   : > { %v811_v46 = vmul.f32 %v2403_v42, %v2738_v25  ;;  %v777_v25 = vmul.f32 0.03125, %v776_v26  ;;  %v2104_v26 = vld [vmem:[%s3330_s3 + $0x4] ss:$0 sm:$0xff] }
 0x4d6   : > { %v820_v48 = vmul.f32 %v818_v44, %v811_v46 }
 0x4d7   : > { %v2405_v49 = vpop.eup %2404 }
 0x4d8   : > { %v850_v51 = vmul.f32 %v2405_v49, %v2742_v30  ;;  %v829_v53 = vadd.f32 %v827_v45, %v820_v48  ;;  %v778_v30 = vadd.f32 1e-05, %v777_v25  ;;  %v2407_v63 = vpop.eup %2406  ;;  %v2294_v25 = vld [vmem:[%s3334_s7 + $0xc] ss:$16 sps:$4 sm:$0xff]  }
 0x4d9   : > { %v552_v0 = vmul.f32 %v2407_v63, %v2748_v37  ;;  %v784_v37 = vrot.slane %v2689_v39, %v2823_v4  ;;  %1346 = vmatprep.subr.bf16.mxu0 %v2294_v25  ;;  %v2300_v63 = vld [vmem:[%s3334_s7 + $0x2c] ss:$16 sps:$4 sm:$0xff]   ;;  %v2358_v25 = vld [vmem:[%s3334_s7 + $0x168] ss:$16 sps:$4 sm:$0xff]  }
 0x4da   : > { %v859_v55 = vmul.f32 %v857_v41, %v850_v51  ;;  %v2805_v56 = vmax.f32 %v829_v53, 0.0  ;;  %2408 = vrsqrt.f32 %v778_v30  ;;  %v2296_v30 = vld [vmem:[%s3334_s7 + $0x24] ss:$16 sps:$4 sm:$0xff]  }
 0x4db   : > { %v587_v2 = vmul.f32 %v2102_v1, %v552_v0  ;;  %v2298_v0 = vld [vmem:[%s3334_s7 + $0x28] ss:$16 sps:$4 sm:$0xff]   ;;  %v2301_v1 = vld [vmem:[%s3334_s7 + $0x20] ss:$16 sps:$4 sm:$0xff]  }
 0x4dc   : > { %v910_v58 = vmul.f32 %v2805_v56, %v2805_v56  ;;  %v868_v59 = vadd.f32 %v866_v54, %v859_v55 }
 0x4dd   : > { %v2825_v7 = vadd.f32 %v2107_v3, %v587_v2  ;;  %v2302_v2 = vld [vmem:[%s3334_s7 + $0x44] ss:$16 sps:$4 sm:$0xff]   ;;  %v2306_v3 = vld [vmem:[%s3334_s7 + $0x4c] ss:$16 sps:$4 sm:$0xff]  }
 0x4de   : > { %v2809_v60 = vmax.f32 %v868_v59, 0.0  ;;  %912 = vrot.lane.b32.xlu0 %v910_v58, %s3339_s15  ;;  %v2290_v59 = vld [vmem:[%s3334_s7 + $0x4] ss:$16 sps:$4 sm:$0xff]  }
 0x4df   : > { %v886_v12 = vmul.f32 %v2825_v7, %v2825_v7  ;;  %1305 = vmatprep.subr.bf16.mxu1 %v2290_v59  ;;  %v2360_v59 = vld [vmem:[%s3334_s7 + $0x16c] ss:$16 sps:$4 sm:$0xff]  }
 0x4e0   : > { %v922_v62 = vmul.f32 %v2809_v60, %v2809_v60 }
 0x4e1   : > { %v887_v15 = vsel %vm488_vm0, %v886_v12, 0.0  ;;  %v2312_v12 = vld [vmem:[%s3334_s7 + $0x6c] ss:$16 sps:$4 sm:$0xff]  }
 0x4e2   : > { %924 = vrot.lane.b32.xlu1 %v922_v62, %s3340_s16  ;;  %v2295_v62 = vld [vmem:[%s3334_s7] ss:$16 sps:$4 sm:$0xff]   ;;  %s2003_s16 = sshll.u32 %s460_s0, 4  ;;  %s3284_s16 = int_to_ptr.vmem [resolvable:$true] %s2003_s16 }
 0x4e3   : > { %1306 = vmatpush1.bf16.msra.mxu1 %v2295_v62  ;;  %v2362_v62 = vld [vmem:[%s3334_s7 + $0x184] ss:$16 sps:$4 sm:$0xff]  }
 0x4e4   : > { %v2409_v5 = vpop.eup %2408  ;;  %1307 = vmatprep.subr.bf16.mxu1 %v2296_v30  ;;  %v2366_v30 = vld [vmem:[%s3334_s7 + $0x18c] ss:$16 sps:$4 sm:$0xff]  }
 0x4e5   : > { %v780_v10 = vmul.f32 %v2409_v5, %v2756_v52  ;;  %v2304_v5 = vld [vmem:[%s3334_s7 + $0x48] ss:$16 sps:$4 sm:$0xff]  }
 0x4e7   : > { %v785_v13 = vmul.f32 %v784_v37, %v780_v10  ;;  %1308 = vmatpush1.bf16.msra.mxu1 %v2301_v1  ;;  %v2307_v10 = vld [vmem:[%s3334_s7 + $0x40] ss:$16 sps:$4 sm:$0xff]   ;;  %v2308_v37 = vld [vmem:[%s3334_s7 + $0x64] ss:$16 sps:$4 sm:$0xff]  }
 0x4e8   : > { %1309 = vmatprep.subr.bf16.mxu1 %v2302_v2  ;;  %v2368_v1 = vld [vmem:[%s3334_s7 + $0x1a4] ss:$16 sps:$4 sm:$0xff]   ;;  %v2372_v2 = vld [vmem:[%s3334_s7 + $0x1ac] ss:$16 sps:$4 sm:$0xff]  }
 0x4e9   : > { %v2837_v16 = vadd.f32 %v789_v14, %v785_v13  ;;  %v2310_v13 = vld [vmem:[%s3334_s7 + $0x68] ss:$16 sps:$4 sm:$0xff]   ;;  %v2313_v14 = vld [vmem:[%s3334_s7 + $0x60] ss:$16 sps:$4 sm:$0xff]  }
 0x4eb   : > { %v894_v52 = vmul.f32 %v2837_v16, %v2837_v16  ;;  %1310 = vmatpush1.bf16.msra.mxu1 %v2307_v10 }
 0x4ec   : > { %1311 = vmatprep.subr.bf16.mxu1 %v2308_v37  ;;  %v2373_v37 = vld [vmem:[%s3334_s7 + $0x1a0] ss:$16 sps:$4 sm:$0xff]  }
 0x4ed   : > { %v895_v17 = vsel %vm488_vm0, %v894_v52, 0.0  ;;  %v2318_v52 = vld [vmem:[%s3334_s7 + $0x8c] ss:$16 sps:$4 sm:$0xff]  }
 0x4ef   : > { %1312 = vmatpush1.bf16.msra.mxu1 %v2313_v14 }
 0x4fd   : > { %888 = vadd.xlane.f32.xlu0 %v887_v15  ;;  %v2314_v15 = vld [vmem:[%s3334_s7 + $0x84] ss:$16 sps:$4 sm:$0xff]  }
 0x4fe   : > { %1313 = vmatprep.subr.bf16.mxu1 %v2314_v15 }
 0x506   : > { %896 = vadd.xlane.f32.xlu1 %v895_v17  ;;  %v2316_v17 = vld [vmem:[%s3334_s7 + $0x88] ss:$16 sps:$4 sm:$0xff]  }
 0x508   : > { %v534_v18 = vpop.xlane.xlu1 %533 }
 0x509   : > { %v539_v19 = vmul.f32 0.03125, %v534_v18  ;;  %v522_v20 = vpop.xlane.xlu0 %521  ;;  %v2319_v18 = vld [vmem:[%s3334_s7 + $0x80] ss:$16 sps:$4 sm:$0xff]  }
 0x50a   : > { %v535_v21 = vmul.f32 0.03125, %v522_v20  ;;  %v2324_v20 = vld [vmem:[%s3334_s7 + $0xac] ss:$16 sps:$4 sm:$0xff]   ;;  %1314 = vmatpush1.bf16.msra.mxu1 %v2319_v18  ;;  %v3046_v18 = vrot.slane %v2768_v61, %v2708_v47 }
 0x50b   : > { %v544_v23 = vadd.f32 1e-05, %v539_v19  ;;  %v2320_v19 = vld [vmem:[%s3334_s7 + $0xa4] ss:$16 sps:$4 sm:$0xff]  }
 0x50c   : > { %v540_v24 = vadd.f32 1e-05, %v535_v21  ;;  %v2322_v21 = vld [vmem:[%s3334_s7 + $0xa8] ss:$16 sps:$4 sm:$0xff]   ;;  %1315 = vmatprep.subr.bf16.mxu1 %v2320_v19 }
 0x50d   : > { %2410 = vrsqrt.f32 %v544_v23  ;;  %v2325_v23 = vld [vmem:[%s3334_s7 + $0xa0] ss:$16 sps:$4 sm:$0xff]  }
 0x50e   : > { %2412 = vrsqrt.f32 %v540_v24  ;;  %v2326_v24 = vld [vmem:[%s3334_s7 + $0xc4] ss:$16 sps:$4 sm:$0xff]   ;;  %1316 = vmatpush1.bf16.msra.mxu1 %v2325_v23 }
 0x50f   : > { %1317 = vmatprep.subr.bf16.mxu1 %v2326_v24 }
 0x517   : > { %v2411_v39 = vpop.eup %2410 }
 0x518   : > { %v2413_v28 = vpop.eup %2412  ;;  %v554_v31 = vmul.f32 %v2411_v39, %v2782_v8  ;;  %v2330_v39 = vld [vmem:[%s3334_s7 + $0xcc] ss:$16 sps:$4 sm:$0xff]  }
 0x519   : > { %v550_v32 = vmul.f32 %v2413_v28, %v2784_v9  ;;  %v2331_v28 = vld [vmem:[%s3334_s7 + $0xc0] ss:$16 sps:$4 sm:$0xff]  }
 0x51a   : > { %v589_v36 = vmul.f32 %v2104_v26, %v554_v31  ;;  %v2328_v26 = vld [vmem:[%s3334_s7 + $0xc8] ss:$16 sps:$4 sm:$0xff]   ;;  %v2336_v31 = vld [vmem:[%s3334_s7 + $0xec] ss:$16 sps:$4 sm:$0xff]   ;;  %1318 = vmatpush1.bf16.msra.mxu1 %v2331_v28 }
 0x51b   : > { %v585_v41 = vmul.f32 %v2100_v29, %v550_v32  ;;  %v2332_v29 = vld [vmem:[%s3334_s7 + $0xe4] ss:$16 sps:$4 sm:$0xff]   ;;  %v2334_v32 = vld [vmem:[%s3334_s7 + $0xe8] ss:$16 sps:$4 sm:$0xff]  }
 0x51c   : > { %v2858_v44 = vadd.f32 %v2109_v34, %v589_v36  ;;  %1319 = vmatprep.subr.bf16.mxu1 %v2332_v29  ;;  %v2338_v34 = vld [vmem:[%s3334_s7 + $0x104] ss:$16 sps:$4 sm:$0xff]   ;;  %v2342_v36 = vld [vmem:[%s3334_s7 + $0x10c] ss:$16 sps:$4 sm:$0xff]  }
 0x51d   : > { %v2856_v42 = vadd.f32 %v2105_v33, %v585_v41  ;;  %v2337_v33 = vld [vmem:[%s3334_s7 + $0xe0] ss:$16 sps:$4 sm:$0xff]   ;;  %v2340_v41 = vld [vmem:[%s3334_s7 + $0x108] ss:$16 sps:$4 sm:$0xff]  }
 0x51e   : > { %v881_v45 = vpop.xlane.xlu1 %880  ;;  %v902_v48 = vmul.f32 %v2858_v44, %v2858_v44  ;;  %1320 = vmatpush1.bf16.msra.mxu1 %v2337_v33 }
 0x51f   : > { %v882_v46 = vmax.f32 %v881_v45, 1e-24  ;;  %v870_v8 = vmul.f32 %v2856_v42, %v2856_v42  ;;  %v2343_v45 = vld [vmem:[%s3334_s7 + $0x100] ss:$16 sps:$4 sm:$0xff]   ;;  %1321 = vmatprep.subr.bf16.mxu1 %v2338_v34 }
 0x520   : > { %v903_v49 = vsel %vm488_vm0, %v902_v48, 0.0  ;;  %v2349_v48 = vld [vmem:[%s3334_s7 + $0x120] ss:$16 sps:$4 sm:$0xff]  }
 0x521   : > { %2414 = vrsqrt.f32 %v882_v46  ;;  %v871_v9 = vsel %vm488_vm0, %v870_v8, 0.0  ;;  %v2348_v8 = vld [vmem:[%s3334_s7 + $0x12c] ss:$16 sps:$4 sm:$0xff]  }
 0x522   : > { %872 = vadd.xlane.f32.xlu0 %v871_v9  ;;  %1322 = vmatpush1.bf16.msra.mxu1 %v2343_v45  ;;  %v2346_v9 = vld [vmem:[%s3334_s7 + $0x128] ss:$16 sps:$4 sm:$0xff]  }
 0x526   : > { %904 = vadd.xlane.f32.xlu0 %v903_v49  ;;  %v2350_v49 = vld [vmem:[%s3334_s7 + $0x144] ss:$16 sps:$4 sm:$0xff]  }
 0x52b   : > { %v2415_v50 = vpop.eup %2414 }
 0x52c   : > { %v2866_v51 = vmul.f32 %v2415_v50, %v882_v46  ;;  %v884_v53 = vmul.f32 %v2415_v50, %v2798_v22  ;;  %v2292_v22 = vld [vmem:[%s3334_s7 + $0x8] ss:$16 sps:$4 sm:$0xff]   ;;  %v2344_v46 = vld [vmem:[%s3334_s7 + $0x124] ss:$16 sps:$4 sm:$0xff]   ;;  %v2354_v50 = vld [vmem:[%s3334_s7 + $0x14c] ss:$16 sps:$4 sm:$0xff]  }
 0x52d   : > { %1347 = vmatpush1.bf16.msra.mxu0 %v2292_v22  ;;  %1323 = vmatprep.subr.bf16.mxu1 %v2344_v46  ;;  %v2361_v22 = vld [vmem:[%s3334_s7 + $0x160] ss:$16 sps:$4 sm:$0xff]  }
 0x52e   : > { %935 = vrot.lane.b32.xlu1 %v884_v53, %s2520_s24  ;;  %1348 = vmatprep.subr.bf16.mxu0 %v2300_v63  ;;  %v2352_v53 = vld [vmem:[%s3334_s7 + $0x148] ss:$16 sps:$4 sm:$0xff]   ;;  %s2198_s24 = sshll.u32 %s2608_s21, 7  ;;  %s2526_s21 = smov [#allocation3]  }
 0x52f   : > { %1324 = vmatpush1.bf16.msra.mxu1 %v2349_v48  ;;  %v2364_v63 = vld [vmem:[%s3334_s7 + $0x188] ss:$16 sps:$4 sm:$0xff]   ;;  %s3282_s29 = scalar_lea.hbm %s3338_s11, %s2198_s24 }
 0x530   : > { %1325 = vmatprep.subr.bf16.mxu1 %v2350_v49 }
 0x531   : > { %1349 = vmatpush1.bf16.msra.mxu0 %v2298_v0  ;;  %v2367_v0 = vld [vmem:[%s3334_s7 + $0x180] ss:$16 sps:$4 sm:$0xff]  }
 0x532   : > { %1350 = vmatprep.subr.bf16.mxu0 %v2306_v3 }
 0x535   : > { %1351 = vmatpush1.bf16.msra.mxu0 %v2304_v5  ;;  %v2370_v5 = vld [vmem:[%s3334_s7 + $0x1a8] ss:$16 sps:$4 sm:$0xff]  }
 0x536   : > { %1352 = vmatprep.subr.bf16.mxu0 %v2312_v12 }
 0x539   : > { %1353 = vmatpush1.bf16.msra.mxu0 %v2310_v13 }
 0x53a   : > { %1354 = vmatprep.subr.bf16.mxu0 %v2318_v52 }
 0x53d   : > { %1355 = vmatpush1.bf16.msra.mxu0 %v2316_v17 }
 0x53e   : > { %1356 = vmatprep.subr.bf16.mxu0 %v2324_v20 }
 0x541   : > { %1357 = vmatpush1.bf16.msra.mxu0 %v2322_v21 }
 0x542   : > { %1358 = vmatprep.subr.bf16.mxu0 %v2330_v39 }
 0x545   : > { %1359 = vmatpush1.bf16.msra.mxu0 %v2328_v26 }
 0x546   : > { %1360 = vmatprep.subr.bf16.mxu0 %v2336_v31 }
 0x549   : > { %1361 = vmatpush1.bf16.msra.mxu0 %v2334_v32 }
 0x54a   : > { %1362 = vmatprep.subr.bf16.mxu0 %v2342_v36 }
 0x54d   : > { %1363 = vmatpush1.bf16.msra.mxu0 %v2340_v41 }
 0x54e   : > { %1364 = vmatprep.subr.bf16.mxu0 %v2348_v8 }
 0x550   : > { %v913_v54 = vpop.permute.xlu0 %912 }
 0x551   : > { %v915_v55 = vsel %vm488_vm0, %v913_v54, 0.0  ;;  %1365 = vmatpush1.bf16.msra.mxu0 %v2346_v9  ;;  %v2355_v54 = vld [vmem:[%s3334_s7 + $0x140] ss:$16 sps:$4 sm:$0xff]  }
 0x552   : > { %916 = vadd.xlane.f32.xlu0 %v915_v55  ;;  %1366 = vmatprep.subr.bf16.mxu0 %v2354_v50 }
 0x553   : > { %1326 = vmatpush1.bf16.msra.mxu1 %v2355_v54 }
 0x554   : > { %v925_v57 = vpop.permute.xlu1 %924 }
 0x555   : > { %v927_v58 = vsel %vm488_vm0, %v925_v57, 0.0  ;;  %1367 = vmatpush1.bf16.msra.mxu0 %v2352_v53 }
 0x556   : > { %928 = vadd.xlane.f32.xlu0 %v927_v58  ;;  %v2356_v58 = vld [vmem:[%s3334_s7 + $0x164] ss:$16 sps:$4 sm:$0xff]   ;;  %1368 = vmatprep.subr.bf16.mxu0 %v2360_v59 }
 0x557   : > { %1327 = vmatprep.subr.bf16.mxu1 %v2356_v58 }
 0x558   : > { %1328 = vmatpush1.bf16.msra.mxu1 %v2361_v22 }
 0x559   : > { %1369 = vmatpush1.bf16.msra.mxu0 %v2358_v25  ;;  %1329 = vmatprep.subr.bf16.mxu1 %v2362_v62 }
 0x55a   : > { %1370 = vmatprep.subr.bf16.mxu0 %v2366_v30 }
 0x55c   : > { %1330 = vmatpush1.bf16.msra.mxu1 %v2367_v0 }
 0x55d   : > { %1371 = vmatpush1.bf16.msra.mxu0 %v2364_v63  ;;  %1331 = vmatprep.subr.bf16.mxu1 %v2368_v1 }
 0x55e   : > { %1372 = vmatprep.subr.bf16.mxu0 %v2372_v2 }
 0x560   : > { %1332 = vmatpush1.bf16.msra.mxu1 %v2373_v37 }
 0x561   : > { %1373 = vmatpush1.bf16.msra.mxu0 %v2370_v5 }
 0x58a   : > { %v889_v55 = vpop.xlane.xlu0 %888 }
 0x58b   : > { %v890_v57 = vmax.f32 %v889_v55, 1e-24 }
 0x58d   : > { %2416 = vrsqrt.f32 %v890_v57 }
 0x593   : > { %v897_v3 = vpop.xlane.xlu1 %896 }
 0x594   : > { %v898_v10 = vmax.f32 %v897_v3, 1e-24 }
 0x596   : > { %2418 = vrsqrt.f32 %v898_v10 }
 0x597   : > { %v2417_v12 = vpop.eup %2416 }
 0x598   : > { %v893_v13 = vmul.f32 %v2417_v12, %v890_v57  ;;  %v892_v14 = vmul.f32 %v2417_v12, %v2825_v7 }
 0x59a   : > { %939 = vrot.lane.b32.xlu0 %v892_v14, %s3346_s12 }
 0x5a0   : > { %v2419_v15 = vpop.eup %2418  ;;  %v936_v55 = vpop.permute.xlu1 %935 }
 0x5a1   : > { %v901_v52 = vmul.f32 %v2419_v15, %v898_v10  ;;  %v900_v17 = vmul.f32 %v2419_v15, %v2837_v16 }
 0x5a3   : > { %943 = vrot.lane.b32.xlu1 %v900_v17, %s3347_s13  ;;  %s2454_s13 = scalar_lea.vmem %s3284_s16, 128 }
 0x5a4   : > { %p2455_p0 = scmp.ne.s32.totalorder %s3284_s16, %s2454_s13 }
 0x5a6   : > { %p2456_p1 = pnand %p2455_p0, %p2626_p6 }
 0x5a7   : > { %1426 = vrot.lane.b32.xlu1 %v3046_v18, %s3346_s12 }
 0x5a8   : > { %p2457_p2 = pneg %p2456_p1 }
 0x5af   : > { %v873_v19 = vpop.xlane.xlu0 %872 }
 0x5b0   : > { %v874_v20 = vmax.f32 %v873_v19, 1e-24 }
 0x5b2   : > { %2420 = vrsqrt.f32 %v874_v20 }
 0x5b3   : > { %v905_v21 = vpop.xlane.xlu0 %904 }
 0x5b4   : > { %v906_v7 = vmax.f32 %v905_v21, 1e-24 }
 0x5b6   : > { %2422 = vrsqrt.f32 %v906_v7 }
 0x5bc   : > { %v2421_v23 = vpop.eup %2420 }
 0x5bd   : > { %v877_v24 = vmul.f32 %v2421_v23, %v874_v20 }
 0x5bf   : > { %v953_v16 = vsel %vm952_vm5, %v877_v24, %v2866_v51 }
 0x5c0   : > { %v2423_v39 = vpop.eup %2422  ;;  %v955_v26 = vsel %vm954_vm6, %v953_v16, %v893_v13 }
 0x5c1   : > { %v909_v28 = vmul.f32 %v2423_v39, %v906_v7  ;;  %v957_v29 = vsel %vm956_vm7, %v955_v26, %v901_v52  ;;  %v908_v9 = vmul.f32 %v2423_v39, %v2858_v44  ;;  %v876_v44 = vmul.f32 %v2421_v23, %v2856_v42 }
 0x5c3   : > { %v959_v31 = vsel %vm958_vm8, %v957_v29, %v909_v28  ;;  %v946_v57 = vsel %vm488_vm0, %v876_v44, %v936_v55  ;;  %v3119_v55 = vrot.slane %v2768_v61, %v788_v11 }
 0x5df   : > { %v917_v32 = vpop.xlane.xlu0 %916 }
 0x5e0   : > { %v918_v33 = vmax.f32 %v917_v32, 1e-24 }
 0x5e2   : > { %2424 = vrsqrt.f32 %v918_v33 }
 0x5e3   : > { %v929_v34 = vpop.xlane.xlu0 %928 }
 0x5e4   : > { %v930_v36 = vmax.f32 %v929_v34, 1e-24 }
 0x5e6   : > { %2426 = vrsqrt.f32 %v930_v36 }
 0x5ec   : > { %v2425_v41 = vpop.eup %2424 }
 0x5ed   : > { %v921_v45 = vmul.f32 %v2425_v41, %v918_v33  ;;  %v920_v51 = vmul.f32 %v2425_v41, %v2805_v56 }
 0x5ef   : > { %v961_v46 = vsel %vm960_vm9, %v959_v31, %v921_v45  ;;  %v950_v50 = vsel %vm488_vm0, %v908_v9, %v920_v51  ;;  %v3109_v9 = vrot.slane %v2768_v61, %v2725_v6 }
 0x5f0   : > { %v2427_v8 = vpop.eup %2426 }
 0x5f1   : > { %v933_v48 = vmul.f32 %v2427_v8, %v930_v36  ;;  %v932_v49 = vmul.f32 %v2427_v8, %v2809_v60 }
 0x5f3   : > { %v3061_v53 = vsel %vm723_vm4, %v950_v50, %v932_v49  ;;  %v3064_v54 = vsel %vm962_vm10, %v961_v46, %v933_v48 }
 0x5f4   : > { %v965_v56 = vpack.c.bf16 %v3061_v53, %v3061_v53 }
 0x5f6   : > { %2171 = vmatprep.mubr.msk.bf16.mxu1 %vm948_vm11, %v965_v56  ;;  %2172 = vmatprep.mubr.msk.bf16.mxu0 %vm948_vm11, %v965_v56 }
 0x60c   : > { %v940_v60 = vpop.permute.xlu0 %939 }
 0x60d   : > { %v947_v58 = vsel %vm723_vm4, %v946_v57, %v940_v60  ;;  %v3123_v60 = vrot.slane %v2768_v61, %v2823_v4 }
 0x615   : > { %v944_v59 = vpop.permute.xlu1 %943 }
 0x616   : > { %v3074_v25 = vsel %vm948_vm11, %v947_v58, %v944_v59 }
 0x617   : > { %v964_v22 = vpack.c.bf16 %v3074_v25, %v3074_v25 }
 0x619   : > { %1338 = vmatmul.mubr.bf16.vlgmr.msra.gmra.mrb[0].mxu1 %v964_v22  ;;  %1379 = vmatmul.mubr.bf16.vlgmr.msra.gmra.mrb[4].mxu0 %v964_v22  ;;  %v1427_v62 = vpop.permute.xlu1 %1426 }
 0x6ec   : > { %v1339_v30 = vpop.f32.mrb[0].mxu1  ;;  %v1380_v63 = vpop.f32.mrb[4].mxu0 }
 0x6ed   : > { %v1429_v0 = vadd.f32 %v1427_v62, %v1339_v30  ;;  %v1341_v42 = vpop.f32.mrb[1].mxu1  ;;  %v1382_v1 = vpop.f32.mrb[5].mxu0  ;;  %v1549_v12 = vadd.f32 %v1427_v62, %v1380_v63  ;;  %v1391_v33 = vadd.f32 %v3046_v18, %v1339_v30  ;;  %v1528_v34 = vadd.f32 %v3046_v18, %v1380_v63 }
 0x6ee   : > { %v1495_v2 = vadd.f32 %v1427_v62, %v1341_v42  ;;  %v1343_v3 = vpop.f32.mrb[2].mxu1  ;;  %v1384_v5 = vpop.f32.mrb[6].mxu0  ;;  %v1582_v41 = vadd.f32 %v3046_v18, %v1382_v1  ;;  %v1474_v46 = vadd.f32 %v3046_v18, %v1341_v42 }
 0x6ef   : > { %v1344_v10 = vpop.f32.mrb[3].mxu1  ;;  %v1385_v37 = vpop.f32.mrb[7].mxu0  ;;  %1431 = vrot.lane.b32.xlu1 %v1429_v0, %s3346_s12  ;;  %v1392_v36 = vsel %vm723_vm4, %v1391_v33, 0.0  ;;  %v1529_v45 = vsel %vm723_vm4, %v1528_v34, 0.0 }
 0x6f0   : > { %1497 = vrot.lane.b32.xlu0 %v1495_v2, %s3346_s12  ;;  %v1583_v51 = vsel %vm723_vm4, %v1582_v41, 0.0  ;;  %v1475_v8 = vsel %vm723_vm4, %v1474_v46, 0.0 }
 0x6f3   : > { %1551 = vrot.lane.b32.xlu1 %v1549_v12, %s3346_s12 }
 0x761   : > { %v1432_v13 = vpop.permute.xlu1 %1431 }
 0x762   : > { %v1498_v14 = vpop.permute.xlu0 %1497  ;;  %v1434_v15 = vsel %vm723_vm4, %v1432_v13, 0.0 }
 0x763   : > { %1435 = vadd.xlane.f32.xlu0 %v1434_v15  ;;  %v1500_v52 = vsel %vm723_vm4, %v1498_v14, 0.0 }
 0x764   : > { %1501 = vadd.xlane.f32.xlu1 %v1500_v52 }
 0x765   : > { %v1552_v17 = vpop.permute.xlu1 %1551 }
 0x766   : > { %v1554_v19 = vsel %vm723_vm4, %v1552_v17, 0.0 }
 0x767   : > { %1555 = vadd.xlane.f32.xlu0 %v1554_v19 }
 0x7f0   : > { %v1436_v20 = vpop.xlane.xlu0 %1435 }
 0x7f1   : > { %v1437_v21 = vmul.f32 0.015625, %v1436_v20  ;;  %v1502_v7 = vpop.xlane.xlu1 %1501 }
 0x7f2   : > { %v1503_v16 = vmul.f32 0.015625, %v1502_v7 }
 0x7f3   : > { %v3084_v23 = vsub.f32 %v1429_v0, %v1437_v21 }
 0x7f4   : > { %v1556_v24 = vpop.xlane.xlu0 %1555  ;;  %v3091_v29 = vsub.f32 %v1495_v2, %v1503_v16 }
 0x7f5   : > { %v1557_v39 = vmul.f32 0.015625, %v1556_v24  ;;  %v1439_v26 = vmul.f32 %v3084_v23, %v3084_v23 }
 0x7f6   : > { %v1505_v32 = vmul.f32 %v3091_v29, %v3091_v29 }
 0x7f7   : > { %v3088_v28 = vsub.f32 %v1549_v12, %v1557_v39  ;;  %1441 = vrot.lane.b32.xlu0 %v1439_v26, %s3346_s12 }
 0x7f9   : > { %v1559_v31 = vmul.f32 %v3088_v28, %v3088_v28 }
 0x7fb   : > { %1561 = vrot.lane.b32.xlu1 %v1559_v31, %s3346_s12 }
 0x7ff   : > { %1507 = vrot.lane.b32.xlu1 %v1505_v32, %s3346_s12 }
 0x816   : > { %1393 = vadd.xlane.f32.xlu0 %v1392_v36 }
 0x81a   : > { %1530 = vadd.xlane.f32.xlu0 %v1529_v45 }
 0x81e   : > { %1584 = vadd.xlane.f32.xlu0 %v1583_v51 }
 0x823   : > { %1476 = vadd.xlane.f32.xlu1 %v1475_v8 }
 0x834   : > { %1452 = vrot.lane.b32.xlu1 %v3109_v9, %s3346_s12 }
 0x869   : > { %v1442_v48 = vpop.permute.xlu0 %1441 }
 0x86a   : > { %v1444_v49 = vsel %vm723_vm4, %v1442_v48, 0.0 }
 0x86b   : > { %1445 = vadd.xlane.f32.xlu0 %v1444_v49 }
 0x86d   : > { %v1562_v50 = vpop.permute.xlu1 %1561 }
 0x86e   : > { %v1564_v56 = vsel %vm723_vm4, %v1562_v50, 0.0 }
 0x86f   : > { %1565 = vadd.xlane.f32.xlu0 %v1564_v56 }
 0x871   : > { %v1508_v18 = vpop.permute.xlu1 %1507 }
 0x872   : > { %v1510_v44 = vsel %vm723_vm4, %v1508_v18, 0.0 }
 0x873   : > { %1511 = vadd.xlane.f32.xlu1 %v1510_v44 }
 0x884   : > { %1463 = vrot.lane.b32.xlu1 %v3119_v55, %s3346_s12 }
 0x885   : > { %1457 = vrot.lane.b32.xlu0 %v3123_v60, %s3346_s12 }
 0x8a3   : > { %v1394_v57 = vpop.xlane.xlu0 %1393 }
 0x8a4   : > { %v1396_v58 = vmul.f32 0.015625, %v1394_v57 }
 0x8a6   : > { %v3129_v59 = vsub.f32 %v1391_v33, %v1396_v58 }
 0x8a7   : > { %v1531_v22 = vpop.xlane.xlu0 %1530 }
 0x8a8   : > { %v1398_v35 = vmul.f32 %v3129_v59, %v3129_v59  ;;  %v1532_v0 = vmul.f32 0.015625, %v1531_v22 }
 0x8aa   : > { %v1399_v11 = vsel %vm723_vm4, %v1398_v35, 0.0  ;;  %v3139_v5 = vsub.f32 %v1528_v34, %v1532_v0 }
 0x8ab   : > { %v1585_v62 = vpop.xlane.xlu0 %1584  ;;  %1400 = vadd.xlane.f32.xlu1 %v1399_v11 }
 0x8ac   : > { %v1586_v30 = vmul.f32 0.015625, %v1585_v62  ;;  %v1534_v13 = vmul.f32 %v3139_v5, %v3139_v5 }
 0x8ae   : > { %v3134_v63 = vsub.f32 %v1582_v41, %v1586_v30  ;;  %v1535_v14 = vsel %vm723_vm4, %v1534_v13, 0.0 }
 0x8b0   : > { %v1477_v42 = vpop.xlane.xlu1 %1476  ;;  %v1588_v1 = vmul.f32 %v3134_v63, %v3134_v63 }
 0x8b1   : > { %v1478_v2 = vmul.f32 0.015625, %v1477_v42 }
 0x8b2   : > { %v1589_v3 = vsel %vm723_vm4, %v1588_v1, 0.0 }
 0x8b3   : > { %v3141_v10 = vsub.f32 %v1474_v46, %v1478_v2  ;;  %1590 = vadd.xlane.f32.xlu1 %v1589_v3 }
 0x8b4   : > { %v1453_v19 = vpop.permute.xlu1 %1452 }
 0x8b5   : > { %v1480_v37 = vmul.f32 %v3141_v10, %v3141_v10 }
 0x8b7   : > { %v1481_v12 = vsel %vm723_vm4, %v1480_v37, 0.0 }
 0x8b8   : > { %1482 = vadd.xlane.f32.xlu0 %v1481_v12 }
 0x8bc   : > { %1536 = vadd.xlane.f32.xlu0 %v1535_v14 }
 0x8f8   : > { %v1446_v15 = vpop.xlane.xlu0 %1445 }
 0x8f9   : > { %v1447_v52 = vmul.f32 0.015625, %v1446_v15 }
 0x8fb   : > { %v1448_v17 = vadd.f32 1e-05, %v1447_v52 }
 0x8fc   : > { %v1566_v20 = vpop.xlane.xlu0 %1565 }
 0x8fd   : > { %2428 = vrsqrt.f32 %v1448_v17  ;;  %v1567_v21 = vmul.f32 0.015625, %v1566_v20 }
 0x8ff   : > { %v1568_v7 = vadd.f32 1e-05, %v1567_v21 }
 0x900   : > { %v1512_v24 = vpop.xlane.xlu1 %1511  ;;  %v1458_v32 = vpop.permute.xlu0 %1457 }
 0x901   : > { %2430 = vrsqrt.f32 %v1568_v7  ;;  %v1513_v16 = vmul.f32 0.015625, %v1512_v24 }
 0x903   : > { %v1514_v39 = vadd.f32 1e-05, %v1513_v16 }
 0x904   : > { %v1464_v45 = vpop.permute.xlu1 %1463 }
 0x905   : > { %2432 = vrsqrt.f32 %v1514_v39 }
 0x907   : > { %v2429_v26 = vpop.eup %2428 }
 0x908   : > { %v1450_v31 = vmul.f32 %v2429_v26, %v3084_v23 }
 0x90a   : > { %v1455_v33 = vmul.f32 %v1453_v19, %v1450_v31 }
 0x90b   : > { %v2431_v34 = vpop.eup %2430 }
 0x90c   : > { %v1570_v36 = vmul.f32 %v2431_v34, %v3088_v28  ;;  %v1460_v41 = vadd.f32 %v1458_v32, %v1455_v33 }
 0x90e   : > { %v1461_v51 = vmax.f32 %v1460_v41, 0.0  ;;  %v1571_v48 = vmul.f32 %v1570_v36, %v1453_v19 }
 0x90f   : > { %v2433_v46 = vpop.eup %2432 }
 0x910   : > { %v1516_v8 = vmul.f32 %v2433_v46, %v3091_v29  ;;  %v1466_v49 = vmul.f32 %v1464_v45, %v1461_v51  ;;  %v1572_v18 = vadd.f32 %v1571_v48, %v1458_v32  ;;  %v1610_v46 = vrot.slane %v2768_v61, 7 }
 0x912   : > { %v1517_v50 = vmul.f32 %v1516_v8, %v1453_v19  ;;  %1468 = vrot.lane.b32.xlu0 %v1466_v49, %s3346_s12  ;;  %v1573_v23 = vmax.f32 %v1572_v18, 0.0  ;;  %2237 = vpush %v1610_v46 }
 0x914   : > { %v1518_v56 = vadd.f32 %v1517_v50, %v1458_v32  ;;  %v1574_v58 = vmul.f32 %v1573_v23, %v1464_v45 }
 0x916   : > { %v1519_v44 = vmax.f32 %v1518_v56, 0.0 }
 0x918   : > { %v1520_v57 = vmul.f32 %v1519_v44, %v1464_v45 }
 0x91a   : > { %1522 = vrot.lane.b32.xlu1 %v1520_v57, %s3346_s12 }
 0x91e   : > { %1576 = vrot.lane.b32.xlu1 %v1574_v58, %s3346_s12  ;;  %s1990_s12 = scalar_lea.sflag [#allocation4], %s2646_s22 }
 0x938   : > { %v1401_v28 = vpop.xlane.xlu1 %1400 }
 0x939   : > { %v1402_v22 = vmul.f32 0.015625, %v1401_v28 }
 0x93b   : > { %v1403_v35 = vadd.f32 1e-05, %v1402_v22 }
 0x93d   : > { %2434 = vrsqrt.f32 %v1403_v35 }
 0x940   : > { %v1591_v29 = vpop.xlane.xlu1 %1590 }
 0x941   : > { %v1592_v11 = vmul.f32 0.015625, %v1591_v29 }
 0x943   : > { %v1593_v62 = vadd.f32 1e-05, %v1592_v11  ;;  %s2238_s14 = spop %2237 }
 0x944   : > { %v1612_v29 = vstv %s2238_s14  ;;  %s2458_s14 = sshll.u32 %s2526_s21, 4  ;;  %s2459_s14 = int_to_ptr.vmem [resolvable:$false] %s2458_s14 }
 0x945   : > { %v1483_v30 = vpop.xlane.xlu0 %1482  ;;  %2436 = vrsqrt.f32 %v1593_v62  ;;  %s2460_s30 = scalar_lea.vmem %s2459_s14, 256  ;;  %p2461_p3 = scmp.lt.s32.totalorder %s3284_s16, %s2459_s14 }
 0x946   : > { %v1484_v0 = vmul.f32 0.015625, %v1483_v30  ;;  %p2462_p4 = scmp.lt.s32.totalorder %s2460_s30, %s2454_s13 }
 0x947   : > { %v2435_v42 = vpop.eup %2434 }
 0x948   : > { %v1485_v1 = vadd.f32 1e-05, %v1484_v0  ;;  %v1405_v2 = vmul.f32 %v2435_v42, %v3129_v59  ;;  %p2463_p5 = por %p2462_p4, %p2461_p3 }
 0x949   : > { %v1537_v3 = vpop.xlane.xlu0 %1536 }
 0x94a   : > { %2438 = vrsqrt.f32 %v1485_v1  ;;  %v1538_v37 = vmul.f32 0.015625, %v1537_v3  ;;  %v1410_v12 = vmul.f32 %v3109_v9, %v1405_v2  ;;  %p2464_p7 = pnand %p2463_p5, %p2457_p2 }
 0x94c   : > { %v1539_v13 = vadd.f32 1e-05, %v1538_v37  ;;  %v1415_v14 = vadd.f32 %v3123_v60, %v1410_v12 }
 0x94e   : > { %2440 = vrsqrt.f32 %v1539_v13  ;;  %v1416_v15 = vmax.f32 %v1415_v14, 0.0 }
 0x94f   : > { %v2437_v52 = vpop.eup %2436 }
 0x950   : > { %v1421_v17 = vmul.f32 %v3119_v55, %v1416_v15  ;;  %v1595_v20 = vmul.f32 %v2437_v52, %v3134_v63 }
 0x952   : > { %v1422_v19 = vsel %vm723_vm4, %v1421_v17, 0.0  ;;  %v1596_v24 = vmul.f32 %v1595_v20, %v3109_v9  ;;  %v1633_v17 = vld [vmem:[%s3335_s8] sm:$0xff]  ;;  %v2524_v20 = vmov 65535  }
 0x953   : > { %1423 = vadd.xlane.f32.xlu1 %v1422_v19  ;;  %v2174_v19 = vcombine.high %v1633_v17, %v1633_v17 }
 0x954   : > { %v2439_v21 = vpop.eup %2438  ;;  %v1597_v33 = vadd.f32 %v1596_v24, %v3123_v60 }
 0x955   : > { %v1487_v59 = vmul.f32 %v2439_v21, %v3141_v10  ;;  %v1644_v21 = vsel %vm1642_vm13, 4294967295, %v2524_v20 }
 0x956   : > { %v1598_v41 = vmax.f32 %v1597_v33, 0.0  ;;  %v2379_v33 = vld [vmem:[%s3336_s9 + $0x18] sm:$0xff]  }
 0x957   : > { %v1488_v7 = vmul.f32 %v1487_v59, %v3109_v9  ;;  %v2173_v59 = vcombine.low %v1633_v17, %v1633_v17 }
 0x958   : > { %v2441_v16 = vpop.eup %2440 }
 0x959   : > { %v1489_v39 = vadd.f32 %v1488_v7, %v3123_v60  ;;  %v1541_v26 = vmul.f32 %v2441_v16, %v3139_v5  ;;  %v1599_v5 = vmul.f32 %v1598_v41, %v3119_v55  ;;  %v1645_v7 = vsel %vm1643_vm14, %v1644_v21, 0  ;;  %v2384_v41 = vld [vmem:[%s3336_s9 + $0x40] sm:$0xff]  }
 0x95a   : > { %v1650_v24 = vand.u32 %v2174_v19, %v1645_v7  ;;  %v2525_v16 = vmov 0  }
 0x95b   : > { %v1490_v31 = vmax.f32 %v1489_v39, 0.0  ;;  %v1542_v32 = vmul.f32 %v1541_v26, %v3109_v9  ;;  %v1600_v9 = vsel %vm723_vm4, %v1599_v5, 0.0  ;;  %1684 = vmatprep.mubr.bf16.mxu0 %v2525_v16  ;;  %1816 = vmatprep.subr.bf16.mxu1 %v2525_v16  ;;  %v1647_v39 = vand.u32 %v2173_v59, %v1645_v7  ;;  %v2376_v26 = vld [vmem:[%s3336_s9] sm:$0xff]   ;;  %v2387_v5 = vld [vmem:[%s3336_s9 + $0x58] sm:$0xff]  }
 0x95c   : > { %1652 = vmatprep.subr.bf16.mxu0 %v1650_v24  ;;  %1817 = vmatpush1.bf16.msra.mxu1 %v2376_v26 }
 0x95d   : > { %v1491_v34 = vmul.f32 %v1490_v31, %v3119_v55  ;;  %v1543_v63 = vadd.f32 %v1542_v32, %v3123_v60  ;;  %1653 = vmatpush1.bf16.msra.mxu0 %v1647_v39  ;;  %v2377_v31 = vld [vmem:[%s3336_s9 + $0x8] sm:$0xff]   ;;  %1818 = vmatprep.subr.bf16.mxu1 %v2525_v16  ;;  %v2378_v32 = vld [vmem:[%s3336_s9 + $0x10] sm:$0xff]  }
 0x95e   : > { %2223 = vmatprep.subr.bf16.mxu0 %v2518_v27 }
 0x95f   : > { %v1492_v10 = vsel %vm723_vm4, %v1491_v34, 0.0  ;;  %v1544_v36 = vmax.f32 %v1543_v63, 0.0  ;;  %v2380_v34 = vld [vmem:[%s3336_s9 + $0x20] sm:$0xff]   ;;  %v2381_v63 = vld [vmem:[%s3336_s9 + $0x28] sm:$0xff]  }
 0x960   : > { %1493 = vadd.xlane.f32.xlu0 %v1492_v10  ;;  %1819 = vmatpush1.bf16.msra.mxu1 %v2377_v31  ;;  %v2382_v10 = vld [vmem:[%s3336_s9 + $0x30] sm:$0xff]  }
 0x961   : > { %v1545_v45 = vmul.f32 %v1544_v36, %v3119_v55  ;;  %1820 = vmatprep.subr.bf16.mxu1 %v2525_v16  ;;  %v2383_v36 = vld [vmem:[%s3336_s9 + $0x38] sm:$0xff]  }
 0x963   : > { %v1546_v51 = vsel %vm723_vm4, %v1545_v45, 0.0  ;;  %v2385_v45 = vld [vmem:[%s3336_s9 + $0x48] sm:$0xff]  }
 0x964   : > { %1547 = vadd.xlane.f32.xlu1 %v1546_v51  ;;  %1821 = vmatpush1.bf16.msra.mxu1 %v2378_v32  ;;  %v2386_v51 = vld [vmem:[%s3336_s9 + $0x50] sm:$0xff]  }
 0x965   : > { %1822 = vmatprep.subr.bf16.mxu1 %v2525_v16 }
 0x968   : > { %1601 = vadd.xlane.f32.xlu1 %v1600_v9  ;;  %1823 = vmatpush1.bf16.msra.mxu1 %v2379_v33 }
 0x969   : > { %1824 = vmatprep.subr.bf16.mxu1 %v2525_v16 }
 0x96c   : > { %1825 = vmatpush1.bf16.msra.mxu1 %v2380_v34 }
 0x96d   : > { %1826 = vmatprep.subr.bf16.mxu1 %v2525_v16 }
 0x970   : > { %1827 = vmatpush1.bf16.msra.mxu1 %v2381_v63 }
 0x971   : > { %1828 = vmatprep.subr.bf16.mxu1 %v2525_v16 }
 0x974   : > { %1829 = vmatpush1.bf16.msra.mxu1 %v2382_v10 }
 0x975   : > { %1830 = vmatprep.subr.bf16.mxu1 %v2525_v16 }
 0x978   : > { %1831 = vmatpush1.bf16.msra.mxu1 %v2383_v36 }
 0x979   : > { %1832 = vmatprep.subr.bf16.mxu1 %v2525_v16 }
 0x97c   : > { %1833 = vmatpush1.bf16.msra.mxu1 %v2384_v41 }
 0x97d   : > { %1834 = vmatprep.subr.bf16.mxu1 %v2525_v16 }
 0x980   : > { %1835 = vmatpush1.bf16.msra.mxu1 %v2385_v45 }
 0x981   : > { %1836 = vmatprep.subr.bf16.mxu1 %v2525_v16 }
 0x984   : > { %v1469_v8 = vpop.permute.xlu0 %1468  ;;  %1837 = vmatpush1.bf16.msra.mxu1 %v2386_v51 }
 0x985   : > { %v1471_v60 = vsel %vm723_vm4, %v1469_v8, 0.0  ;;  %1838 = vmatprep.subr.bf16.mxu1 %v2525_v16 }
 0x986   : > { %1472 = vadd.xlane.f32.xlu0 %v1471_v60 }
 0x988   : > { %1839 = vmatpush1.bf16.msra.mxu1 %v2387_v5 }
 0x989   : > { %1840 = vmatprep.subr.bf16.mxu1 %v2525_v16 }
 0x98c   : > { %v1523_v48 = vpop.permute.xlu1 %1522 }
 0x98d   : > { %v1525_v49 = vsel %vm723_vm4, %v1523_v48, 0.0 }
 0x98e   : > { %1526 = vadd.xlane.f32.xlu0 %v1525_v49  ;;  %v2388_v49 = vld [vmem:[%s3336_s9 + $0x60] sm:$0xff]  }
 0x98f   : > { %1841 = vmatpush1.bf16.msra.mxu1 %v2388_v49 }
 0x990   : > { %v1577_v50 = vpop.permute.xlu1 %1576  ;;  %1842 = vmatprep.subr.bf16.mxu1 %v2525_v16 }
 0x991   : > { %v1579_v56 = vsel %vm723_vm4, %v1577_v50, 0.0  ;;  %v2389_v50 = vld [vmem:[%s3336_s9 + $0x68] sm:$0xff]  }
 0x992   : > { %1580 = vadd.xlane.f32.xlu0 %v1579_v56 }
 0x993   : > { %1843 = vmatpush1.bf16.msra.mxu1 %v2389_v50 }
 0x9e0   : > { %v1424_v44 = vpop.xlane.xlu1 %1423 }
 0x9ed   : > { %v1494_v55 = vpop.xlane.xlu0 %1493 }
 0x9f1   : > { %v1548_v57 = vpop.xlane.xlu1 %1547 }
 0x9f5   : > { %v1602_v11 = vpop.xlane.xlu1 %1601 }
 0xa13   : > { %v1473_v18 = vpop.xlane.xlu0 %1472 }
 0xa14   : > { %v1603_v23 = vsel %vm952_vm5, %v1424_v44, %v1473_v18 }
 0xa15   : > { %v1604_v58 = vsel %vm954_vm6, %v1603_v23, %v1494_v55 }
 0xa1b   : > { %v1527_v61 = vpop.xlane.xlu0 %1526 }
 0xa1c   : > { %v1605_v28 = vsel %vm956_vm7, %v1604_v58, %v1527_v61  ;;  %v3243_v58 = vld [vmem:[%s3332_s5 + $0x10] sm:$0xff] }
 0xa1d   : > { %v1606_v35 = vsel %vm958_vm8, %v1605_v28, %v1548_v57  ;;  %v1728_v28 = vrot.slane %v3243_v58, %v2684_v38  ;;  %v2391_v38 = vld [vmem:[%s3337_s10 + $0x8] sm:$0xff]   ;;  %v1877_v19 = vrot.slane %v3243_v58, %v2701_v43  ;;  %v1976_v41 = vrot.slane %v3243_v58, %v2725_v6 }
 0xa1e   : > { %v1981_v51 = vrot.slane %v3243_v58, %v2823_v4 }
 0xa1f   : > { %v1581_v22 = vpop.xlane.xlu0 %1580 }
 0xa20   : > { %v1607_v62 = vsel %vm960_vm9, %v1606_v35, %v1581_v22 }
 0xa21   : > { %v1608_v30 = vsel %vm962_vm10, %v1607_v62, %v1602_v11 }
 0xa22   : > { %v1614_v0 = vadd.f32 %v1612_v29, %v1608_v30 }
 0xa24   : > { %v1615_v42 = vmul.f32 0.5, %v1614_v0 }
 0xa26   : > { %2442 = vtanh.f32 %v1615_v42 }
 0xa30   : > { %v2443_v1 = vpop.eup %2442 }
 0xa31   : > { %v1617_v2 = vadd.f32 1.0, %v2443_v1 }
 0xa33   : > { %v1618_v3 = vmul.f32 0.5, %v1617_v2  ;;  %v2390_v2 = vld [vmem:[%s3337_s10] sm:$0xff]  }
 0xa35   : > { %v1620_v37 = vsel %vm1619_vm12, %v1618_v3, -inf }
 0xa36   : > { %1621 = vmax.xlane.f32.xlu0 %v1620_v37  ;;  %v2393_v37 = vld [vmem:[%s3337_s10 + $0x18] sm:$0xff]  }
 0xac3   : > { %v1622_v12 = vpop.xlane.xlu0 %1621 }
 0xac4   : > { %v1623_v13 = vsub.f32 %v1618_v3, %v1622_v12  ;;  %v2392_v3 = vld [vmem:[%s3337_s10 + $0x10] sm:$0xff]  }
 0xac6   : > { %v1624_v14 = vmul.f32 1.442695, %v1623_v13 }
 0xac8   : > { %2444 = vpow2.f32 %v1624_v14 }
 0xad2   : > { %v2445_v15 = vpop.eup %2444 }
 0xad3   : > { %v1626_v52 = vsel %vm1619_vm12, %v2445_v15, 0.0 }
 0xad4   : > { %1627 = vadd.xlane.f32.xlu1 %v1626_v52 }
 0xb61   : > { %v1628_v9 = vpop.xlane.xlu1 %1627 }
 0xb62   : > { %2446 = vrcp.f32 %v1628_v9 }
 0xb6c   : > { %v2447_v46 = vpop.eup %2446 }
 0xb6d   : > { %v1630_v8 = vmul.f32 %v2447_v46, %v2445_v15  ;;  %v1872_v15 = vrot.slane %v3243_v58, %v2693_v40 }
 0xb6f   : > { %v1631_v60 = vmul.f32 %v1630_v8, %v3064_v54 }
 0xb71   : > { %v1632_v48 = vpack.c.bf16 %v1631_v60, %v1631_v60 }
 0xb73   : > { %2175 = vmatmul.mubr.msk.bf16.vlgmr.msra.gmra.mrb[8].mxu0 %vm1619_vm12, %v1632_v48 }
 0xb74   : > { %2231 = vmatprep.mubr.msk.bf16.mxu0 %vm2519_vm2, %v2518_v27  ;;  %2224 = vmatpush3.bf16.msra.mxu0 %v2390_v2 }
 0xb75   : > { %2225 = vmatprep.subr.bf16.mxu0 %v2518_v27 }
 0xb78   : > { %2226 = vmatpush3.bf16.msra.mxu0 %v2391_v38 }
 0xb79   : > { %2227 = vmatprep.subr.bf16.mxu0 %v2518_v27 }
 0xb7c   : > { %2228 = vmatpush3.bf16.msra.mxu0 %v2392_v3 }
 0xb7d   : > { %2229 = vmatprep.subr.bf16.mxu0 %v2518_v27  ;;  %v1892_v27 = vrot.slane %v3243_v58, %v2708_v47 }
 0xb80   : > { %2230 = vmatpush3.bf16.msra.mxu0 %v2393_v37 }
 0xc46   : > { %v1686_v56 = vpop.f32.mrb[8].mxu0 }
 0xc47   : > { %v1693_v54 = vmul.f32 %v1686_v56, %v3074_v25  ;;  %v1688_v55 = vpop.f32.mrb[9].mxu0 }
 0xc48   : > { %v1694_v18 = vmul.f32 %v1688_v55, %v3061_v53  ;;  %v1690_v44 = vpop.f32.mrb[10].mxu0 }
 0xc49   : > { %v1691_v23 = vpop.f32.mrb[11].mxu0  ;;  %v1695_v61 = vpack.c.bf16 %v1693_v54, %v1693_v54 }
 0xc4a   : > { %v1696_v57 = vpack.c.bf16 %v1694_v18, %v1694_v18 }
 0xc4c   : > { %2190 = vmatprep.mubr.msk.bf16.mxu1 %vm948_vm11, %v1696_v57 }
 0xc4d   : > { %1849 = vmatmul.mubr.bf16.vlgmr.msra.gmra.mrb[4].mxu1 %v1695_v61 }
 0xd20   : > { %v1850_v22 = vpop.f32.mrb[4].mxu1 }
 0xd21   : > { %v1851_v25 = vadd.f32 %v1850_v22, %v1728_v28  ;;  %v1852_v35 = vpop.f32.mrb[5].mxu1 }
 0xd22   : > { %v1853_v29 = vpop.f32.mrb[6].mxu1 }
 0xd23   : > { %v1854_v53 = vpop.f32.mrb[7].mxu1  ;;  %v1856_v11 = vsel %vm723_vm4, %v1851_v25, 0.0 }
 0xd24   : > { %1857 = vadd.xlane.f32.xlu0 %v1856_v11 }
 0xdb1   : > { %v1858_v62 = vpop.xlane.xlu0 %1857 }
 0xdb2   : > { %v1859_v30 = vmul.f32 0.015625, %v1858_v62 }
 0xdb4   : > { %v1860_v0 = vsub.f32 %v1851_v25, %v1859_v30 }
 0xdb6   : > { %v1861_v42 = vmul.f32 %v1860_v0, %v1860_v0 }
 0xdb8   : > { %v1862_v1 = vsel %vm723_vm4, %v1861_v42, 0.0 }
 0xdb9   : > { %1863 = vadd.xlane.f32.xlu1 %v1862_v1 }
 0xe46   : > { %v1864_v12 = vpop.xlane.xlu1 %1863 }
 0xe47   : > { %v1865_v13 = vmul.f32 0.015625, %v1864_v12 }
 0xe49   : > { %v1866_v14 = vadd.f32 1e-05, %v1865_v13 }
 0xe4b   : > { %2448 = vrsqrt.f32 %v1866_v14 }
 0xe55   : > { %v2449_v52 = vpop.eup %2448 }
 0xe56   : > { %v1868_v17 = vmul.f32 %v2449_v52, %v1860_v0 }
 0xe58   : > { %v1873_v20 = vmul.f32 %v1872_v15, %v1868_v17 }
 0xe5a   : > { %v1878_v21 = vadd.f32 %v1877_v19, %v1873_v20 }
 0xe5c   : > { %v1879_v59 = vmax.f32 %v1878_v21, 0.0 }
 0xe5e   : > { %v1880_v7 = vpack.c.bf16 %v1879_v59, %v1879_v59 }
 0xe60   : > { %2232 = vmatmul.mubr.msk.bf16.vlgmr.msra.gmra.mrb[12].mxu0 %vm723_vm4, %v1880_v7 }
 0xf33   : > { %v1954_v24 = vpop.f32.mrb[12].mxu0 }
 0xf34   : > { %v1955_v16 = vadd.f32 %v1954_v24, %v1892_v27  ;;  %v2233_v39 = vpop.f32.mrb[13].mxu0 }
 0xf35   : > { %v1957_v26 = vpop.f32.mrb[14].mxu0 }
 0xf36   : > { %v2234_v31 = vpop.f32.mrb[15].mxu0  ;;  %v1960_v40 = vsel %vm488_vm0, %v1955_v16, 0.0 }
 0xf37   : > { %1961 = vadd.xlane.f32.xlu0 %v1960_v40 }
 0xfc4   : > { %v1962_v32 = vpop.xlane.xlu0 %1961 }
 0xfc5   : > { %v1963_v33 = vmul.f32 0.03125, %v1962_v32 }
 0xfc7   : > { %v1964_v43 = vsub.f32 %v1955_v16, %v1963_v33 }
 0xfc9   : > { %v1965_v34 = vmul.f32 %v1964_v43, %v1964_v43 }
 0xfcb   : > { %v1966_v63 = vsel %vm488_vm0, %v1965_v34, 0.0 }
 0xfcc   : > { %1967 = vadd.xlane.f32.xlu1 %v1966_v63 }
0x1059   : > { %v1968_v10 = vpop.xlane.xlu1 %1967 }
0x105a   : > { %v1969_v36 = vmul.f32 0.03125, %v1968_v10 }
0x105c   : > { %v1970_v47 = vadd.f32 1e-05, %v1969_v36 }
0x105e   : > { %2450 = vrsqrt.f32 %v1970_v47 }
0x1068   : > { %v2451_v45 = vpop.eup %2450 }
0x1069   : > { %v1972_v5 = vmul.f32 %v2451_v45, %v1964_v43 }
0x106b   : > { %v1977_v9 = vmul.f32 %v1976_v41, %v1972_v5 }
0x106d   : > { %v1982_v46 = vadd.f32 %v1981_v51, %v1977_v9 }
0x106f   : > { %2452 = vtanh.f32 %v1982_v46 }
0x1079   : > { %v2453_v8 = vpop.eup %2452 }
0x107a   : > { %vm1984_vm15 = vcmp.ne.f32.partialorder %v2453_v8, %v2453_v8 }
0x107b   : > { %v1985_v60 = vsel %vm1984_vm15, 0.0, %v2453_v8 }
0x107c   : > { %v2196_v48 = vclamps-f32 %v1985_v60, 5.0 }
0x107e   : > { %1988 = vst.msk [vmem:[%s460_s0] sm:$0xff] %vm488_vm0, %v2196_v48 }
0x107f   : > { %2467 = shalt.err (!%p2464_p7)
}
0x1080   : > { %s2468_s22 = scalar_lea.hbm %s3282_s29, 128  ;;  %s2472_s25 = scalar_lea.hbm %s3338_s11, 256 }
0x1081   : > { %p2469_p10 = scmp.ne.s32.totalorder %s3282_s29, %s2468_s22  ;;  %p2473_p13 = scmp.lt.u32.totalorder %s3282_s29, %s3338_s11 }
0x1082   : > { %p2474_p0 = scmp.lt.u32.totalorder %s2472_s25, %s2468_s22  ;;  %p2476_p2 = scmp.lt.u32.totalorder %s2468_s22, %s3282_s29 }
0x1083   : > { %p2470_p11 = pnand %p2469_p10, %p2626_p6 }
0x1084   : > { %p2475_p1 = por %p2474_p0, %p2473_p13 }
0x1085   : > { %p2471_p12 = pneg %p2470_p11 }
0x1086   : > { %p2477_p3 = por %p2476_p2, %p2475_p1 }
0x1088   : > { %p2478_p4 = pnand %p2477_p3, %p2471_p12 }
0x108a   : > { %2481 = shalt.err (!%p2478_p4)
}
0x108b   : > { %2239 = dma.vmem_to_hbm [thread:$0]  (%p2626_p6), %s3284_s16, 128, %s3282_s29, %s1990_s12  }
0x108c PF: > { %s2015_s13 = sand.u32 1, %s2504_s17   ;;  %p2242_p5 = pnand %p2094_p9, %p2630_p8 }
0x108d   : > { %s2016_s14 = scalar_lea.sflag [#allocation4], %s2015_s13 }
0x108e   : > { %2499 = dma.done.wait (!%p2242_p5), %s2016_s14, 128  }
0x108f   : > { %2501 = vsyncadd (!%p2242_p5), %s2016_s14, 4294967168  ;;  %p21_p7 = scmp.ge.s32.totalorder %s2612_s23, 4   ;;  %s3348_s17 = smov %s2508_s18 }
0x1090   : > { %s3349_s18 = smov %s2512_s19  ;;  %s3350_s19 = smov %s2624_s26 }
0x1091   : > { %s3351_s20 = smov %s2612_s23  ;;  %23 = sbr.rel (!%p21_p7) target bundleno = 5 (0x5), region = 148 }
0x1098   :  { %2021 = vsyncpa [#allocation4], 1 }
0x1099   :  { %2023 = vsyncpa [#allocation4 + $0x1], 1 }

</bundles_post_ra>
